<compile_context>
chip_gen: v6e
topology: v6e:2x2x1
jax: 0.10.0
libtpu: 0.0.40
codegen_flags: <defaults>
</compile_context>

<pallas_src>
import functools
import math

import jax
import jax.numpy as jnp
from jax.experimental import pallas as pl
from jax.experimental.pallas import tpu as pltpu


def vit_kernel(x_ref, pos_ref, w_emb_ref, wqkv_ref, wo_ref, w1_ref, w2_ref,
               wc_ref, bc_ref, vecd_ref, out_ref, *,
               samples, n_tokens, d_model, mlp_dim, n_blocks):
    f32 = jnp.float32
    bf16 = jnp.bfloat16
    S, N, D = samples, n_tokens, d_model
    M = S * N
    grp = N // n_blocks
    mlp_rows = mlp_dim // D

    # packed (>=8, D) f32 slab: rows = [b_emb, g1, be1, g2, be2, bm2, bm1...]
    vd = vecd_ref[...]
    b_emb, g1, be1 = vd[0:1], vd[1:2], vd[2:3]
    g2, be2, bm2 = vd[3:4], vd[4:5], vd[5:6]
    bm1 = vd[6:6 + mlp_rows].reshape(1, mlp_dim)

    # --- patch embedding + positional embedding (pos broadcast in-kernel) ---
    x = x_ref[...]                                            # (M, Ppad) bf16
    h = jnp.dot(x, w_emb_ref[...], preferred_element_type=f32) + b_emb
    h = (h.reshape(S, N, D) + pos_ref[...][None]).reshape(M, D)   # (M, D) f32

    def layer_norm(t, g, b):
        mu = jnp.mean(t, axis=-1, keepdims=True)
        var = jnp.mean((t - mu) * (t - mu), axis=-1, keepdims=True)
        return (t - mu) * jax.lax.rsqrt(var + 1e-5) * g + b

    # --- self attention (single head), pre-LN ---
    # 1/sqrt(D) is folded into the wq columns of wqkv on the host.
    hn = layer_norm(h, g1, be1).astype(bf16)
    qkv = jnp.dot(hn, wqkv_ref[...], preferred_element_type=f32).astype(bf16)
    q = qkv[:, 0:D].reshape(S, N, D)
    k = qkv[:, D:2 * D].reshape(S, N, D)
    v = qkv[:, 2 * D:3 * D].reshape(S, N, D)

    # TODO(synk): for production n_tokens < 128 the (S, N, N) score tensor is
    # lane-sparse; acceptable here, restructure if real N stays small.
    scores = jnp.einsum('bqd,bkd->bqk', q, k, preferred_element_type=f32)
    scores = scores - jnp.max(scores, axis=-1, keepdims=True)
    p = jnp.exp(scores)
    attn = p * pl.reciprocal(jnp.sum(p, axis=-1, keepdims=True), approx=True)
    ctx = jnp.einsum('bqk,bkd->bqd', attn.astype(bf16), v,
                     preferred_element_type=f32).reshape(M, D)
    h = h + jnp.dot(ctx.astype(bf16), wo_ref[...], preferred_element_type=f32)

    # --- MLP, pre-LN ---
    hn2 = layer_norm(h, g2, be2).astype(bf16)
    m = jnp.dot(hn2, w1_ref[...], preferred_element_type=f32) + bm1
    # TODO(synk): PyTorch nn.GELU default is exact erf; tanh approximation used
    # here (erf lowering in Mosaic is not guaranteed).
    m = jax.nn.gelu(m, approximate=True)
    h = h + jnp.dot(m.astype(bf16), w2_ref[...], preferred_element_type=f32) + bm2

    # --- block-wise token pooling: exact f32 mean over grp tokens per block ---
    pooled = jnp.mean(h.reshape(S * n_blocks, grp, D), axis=1)   # (S*blk, D)

    logits = jnp.dot(pooled.astype(bf16), wc_ref[...],
                     preferred_element_type=f32) + bc_ref[...]
    out_ref[...] = logits                                     # (S*blk, Cpad)


def init_transformer_params(key, *, patch_dim, d_model, n_tokens, mlp_dim,
                            class_num):
    ks = jax.random.split(key, 12)
    s = 0.02
    return {
        "w_emb": jax.random.normal(ks[0], (patch_dim, d_model), jnp.float32) * s,
        "b_emb": jnp.zeros((1, d_model), jnp.float32),
        "pos":   jax.random.normal(ks[1], (n_tokens, d_model), jnp.float32) * s,
        "g1":    jnp.ones((1, d_model), jnp.float32),
        "be1":   jnp.zeros((1, d_model), jnp.float32),
        "wq":    jax.random.normal(ks[2], (d_model, d_model), jnp.float32) * s,
        "wk":    jax.random.normal(ks[3], (d_model, d_model), jnp.float32) * s,
        "wv":    jax.random.normal(ks[4], (d_model, d_model), jnp.float32) * s,
        "wo":    jax.random.normal(ks[5], (d_model, d_model), jnp.float32) * s,
        "g2":    jnp.ones((1, d_model), jnp.float32),
        "be2":   jnp.zeros((1, d_model), jnp.float32),
        "w1":    jax.random.normal(ks[6], (d_model, mlp_dim), jnp.float32) * s,
        "bm1":   jnp.zeros((1, mlp_dim), jnp.float32),
        "w2":    jax.random.normal(ks[7], (mlp_dim, d_model), jnp.float32) * s,
        "bm2":   jnp.zeros((1, d_model), jnp.float32),
        "wc":    jax.random.normal(ks[8], (d_model, class_num), jnp.float32) * s,
        "bc":    jnp.zeros((1, class_num), jnp.float32),
    }


def _round_up(x, m):
    return ((x + m - 1) // m) * m


def patchify(x_nchw, patch):
    # NCHW -> (B, n_tokens, C*patch*patch)
    b, c, h, w = x_nchw.shape
    hp, wp = h // patch, w // patch
    x = x_nchw.reshape(b, c, hp, patch, wp, patch)
    x = jnp.transpose(x, (0, 2, 4, 1, 3, 5))                  # B, hp, wp, C, p, p
    return x.reshape(b, hp * wp, c * patch * patch)


def _choose_samples_per_tile(total_samples, n_tokens, n_blocks,
                             target_rows=256):
    """Largest whole-sample tile whose token/output blocks stay (8,128)-aligned,
    row count <= target_rows, and (when possible) >= 2 grid steps so v7x
    megacore has work on both TensorCores."""
    candidates = [d for d in range(1, total_samples + 1)
                  if total_samples % d == 0
                  and (d * n_tokens) % 8 == 0
                  and (d * n_blocks) % 8 == 0
                  and d * n_tokens <= target_rows]
    parallel = [d for d in candidates if total_samples // d >= 2]
    if parallel:
        return max(parallel)
    if candidates:
        return max(candidates)
    return total_samples   # single grid step: blocks equal full array dims


def _estimate_vmem_bytes(inputs, m_tile, samples, n_tokens, d_model, mlp_dim,
                         n_blocks, c_pad):
    """Explicit VMEM budget from the per-tile footprint (plus headroom),
    capped at 64 MiB so it is valid on v7x as well as v5e/v6e."""
    input_bytes = sum(int(a.size) * a.dtype.itemsize for a in inputs)
    io_tile = m_tile * inputs[0].shape[1] * 2 + samples * n_blocks * c_pad * 4
    act = (m_tile * (9 * d_model + 2 * mlp_dim) * 4
           + 2 * samples * n_tokens * n_tokens * 4)
    est = 2 * input_bytes + 2 * io_tile + 2 * act + (8 << 20)
    return int(min(64 << 20, max(32 << 20, est)))


def transformer_forward(x_nchw, params, *, patch, n_blocks, class_num):
    f32 = jnp.float32
    bf16 = jnp.bfloat16
    tokens = patchify(x_nchw, patch)                          # (B, N, P)
    B, N, P = tokens.shape
    D = params["w_emb"].shape[1]
    MLP = params["w1"].shape[1]
    assert N % n_blocks == 0, "n_tokens must be divisible by block"
    assert MLP % D == 0, "mlp_dim must be a multiple of d_model (vecd packing)"

    P_PAD = _round_up(P, 128)
    C_PAD = _round_up(class_num, 128)

    S = _choose_samples_per_tile(B, N, n_blocks)
    num_tiles = B // S
    M_TILE = S * N

    # lane-dense, MXU-friendly host-side prep
    tokens2d = jnp.pad(tokens, ((0, 0), (0, 0), (0, P_PAD - P)))
    tokens2d = tokens2d.reshape(B * N, P_PAD).astype(bf16)
    pos = params["pos"].astype(f32)                           # (N, D), no tile

    w_emb = jnp.pad(params["w_emb"], ((0, P_PAD - P), (0, 0))).astype(bf16)
    scale = 1.0 / math.sqrt(D)
    wqkv = jnp.concatenate(
        [params["wq"] * scale, params["wk"], params["wv"]], axis=1).astype(bf16)
    wo = params["wo"].astype(bf16)
    w1 = params["w1"].astype(bf16)
    w2 = params["w2"].astype(bf16)
    wc = jnp.pad(params["wc"], ((0, 0), (0, C_PAD - class_num))).astype(bf16)
    bc = jnp.pad(params["bc"], ((0, 0), (0, C_PAD - class_num))).astype(f32)

    # pack all (1, D)/(1, MLP) bias/scale vectors into one (>=8, D) f32 slab
    mlp_rows = MLP // D
    vecd = jnp.concatenate(
        [params["b_emb"], params["g1"], params["be1"],
         params["g2"], params["be2"], params["bm2"],
         params["bm1"].reshape(mlp_rows, D)], axis=0).astype(f32)
    vec_rows = 6 + mlp_rows
    vec_pad = _round_up(vec_rows, 8)
    if vec_pad > vec_rows:
        vecd = jnp.pad(vecd, ((0, vec_pad - vec_rows), (0, 0)))

    inputs = [tokens2d, pos, w_emb, wqkv, wo, w1, w2, wc, bc, vecd]

    def _resident2d(shape):
        # constant block index -> fetched once, stays resident across the grid
        return pl.BlockSpec(shape, lambda i: (0, 0))

    in_specs = [pl.BlockSpec((M_TILE, P_PAD), lambda i: (i, 0))]
    in_specs += [_resident2d(a.shape) for a in inputs[1:]]
    out_specs = pl.BlockSpec((S * n_blocks, C_PAD), lambda i: (i, 0))

    kernel = functools.partial(vit_kernel, samples=S, n_tokens=N, d_model=D,
                               mlp_dim=MLP, n_blocks=n_blocks)

    vmem_bytes = _estimate_vmem_bytes(inputs, M_TILE, S, N, D, MLP,
                                      n_blocks, C_PAD)

    out = pl.pallas_call(
        kernel,
        out_shape=jax.ShapeDtypeStruct((B * n_blocks, C_PAD), jnp.float32),
        grid_spec=pltpu.PrefetchScalarGridSpec(
            num_scalar_prefetch=0,
            grid=(num_tiles,),
            in_specs=in_specs,
            out_specs=out_specs,
        ),
        compiler_params=pltpu.CompilerParams(
            dimension_semantics=("parallel",),
            vmem_limit_bytes=vmem_bytes),
    )(*inputs)

    # lane-dense slab back to (B, block, class_num)
    return out.reshape(B, n_blocks, C_PAD)[:, :, :class_num]


def _run_fused(views, params, *, patch, n_blocks, class_num):
    """Run one fused pallas_call over all views sharing the same params."""
    if not views:
        return []
    x = jnp.concatenate(views, axis=0)
    y = transformer_forward(x, params, patch=patch, n_blocks=n_blocks,
                            class_num=class_num)
    outs, off = [], 0
    for v in views:
        outs.append(y[off:off + v.shape[0]])
        off += v.shape[0]
    return outs


@functools.partial(jax.jit,
                   static_argnames=("share_weight", "patch", "n_blocks",
                                    "class_num"))
def three_view_net_forward(x1, x2, x3, x4=None, *, params_1, params_2,
                           share_weight=False, patch, n_blocks, class_num):
    p1 = params_1
    p2 = params_1 if share_weight else params_2

    if share_weight:
        group1 = [(k, v) for k, v in (("y1", x1), ("y2", x2),
                                      ("y3", x3), ("y4", x4)) if v is not None]
        group2 = []
    else:
        group1 = [(k, v) for k, v in (("y1", x1), ("y3", x3)) if v is not None]
        group2 = [(k, v) for k, v in (("y2", x2), ("y4", x4)) if v is not None]

    kwargs = dict(patch=patch, n_blocks=n_blocks, class_num=class_num)
    results = {"y1": None, "y2": None, "y3": None, "y4": None}
    for (k, _), o in zip(group1, _run_fused([v for _, v in group1], p1, **kwargs)):
        results[k] = o
    for (k, _), o in zip(group2, _run_fused([v for _, v in group2], p2, **kwargs)):
        results[k] = o

    if x4 is None:
        return (results["y1"], results["y2"], results["y3"])
    return (results["y1"], results["y2"], results["y3"], results["y4"])


if __name__ == "__main__":
    # small shapes consistent with the forward; feature dims sized lane-dense
    B, C_IN, H, W = 2, 4, 16, 16
    PATCH = 4
    N_TOKENS = (H // PATCH) * (W // PATCH)      # 16
    PATCH_DIM = C_IN * PATCH * PATCH            # 64 (padded to 128 in wrapper)
    D_MODEL = 128
    MLP_DIM = 256
    CLASS_NUM = 8                               # padded to 128 lanes in wrapper
    BLOCK = 4

    key = jax.random.PRNGKey(0)
    k_x1, k_x2, k_x3, k_p1, k_p2 = jax.random.split(key, 5)

    x1 = jax.random.normal(k_x1, (B, C_IN, H, W), jnp.float32)
    x2 = jax.random.normal(k_x2, (B, C_IN, H, W), jnp.float32)
    x3 = jax.random.normal(k_x3, (B, C_IN, H, W), jnp.float32)

    params_1 = init_transformer_params(
        k_p1, patch_dim=PATCH_DIM, d_model=D_MODEL, n_tokens=N_TOKENS,
        mlp_dim=MLP_DIM, class_num=CLASS_NUM)
    params_2 = init_transformer_params(
        k_p2, patch_dim=PATCH_DIM, d_model=D_MODEL, n_tokens=N_TOKENS,
        mlp_dim=MLP_DIM, class_num=CLASS_NUM)

    y1, y2, y3 = three_view_net_forward(
        x1, x2, x3, None,
        params_1=params_1, params_2=params_2, share_weight=False,
        patch=PATCH, n_blocks=BLOCK, class_num=CLASS_NUM)

    jax.block_until_ready((y1, y2, y3))
    assert y1.shape == (B, BLOCK, CLASS_NUM)
    assert y2.shape == (B, BLOCK, CLASS_NUM)
    assert y3.shape == (B, BLOCK, CLASS_NUM)
    print("KERNEL_OK")
</pallas_src>

<mosaic_0001>
module attributes {stable_mosaic.version = 11 : i64} {
  func.func @vit_kernel(%arg0: i32, %arg1: memref<32x128xbf16, #tpu.memory_space<vmem>>, %arg2: memref<16x128xf32, #tpu.memory_space<vmem>>, %arg3: memref<128x128xbf16, #tpu.memory_space<vmem>>, %arg4: memref<128x384xbf16, #tpu.memory_space<vmem>>, %arg5: memref<128x128xbf16, #tpu.memory_space<vmem>>, %arg6: memref<128x256xbf16, #tpu.memory_space<vmem>>, %arg7: memref<256x128xbf16, #tpu.memory_space<vmem>>, %arg8: memref<128x128xbf16, #tpu.memory_space<vmem>>, %arg9: memref<1x128xf32, #tpu.memory_space<vmem>>, %arg10: memref<8x128xf32, #tpu.memory_space<vmem>>, %arg11: memref<8x128xf32, #tpu.memory_space<vmem>>) attributes {dimension_semantics = [#tpu.dimension_semantics<parallel>], iteration_bounds = array<i64: 2>, scalar_prefetch = 0 : i64, scratch_operands = 0 : i64, tpu.core_type = #tpu.core_type<tc>, window_params = [{transform_indices = @transform_0, window_bounds = array<i64: 32, 128>}, {pipeline_mode = #tpu.pipeline_mode<synchronous>, transform_indices = @transform_1, window_bounds = array<i64: 16, 128>}, {pipeline_mode = #tpu.pipeline_mode<synchronous>, transform_indices = @transform_2, window_bounds = array<i64: 128, 128>}, {pipeline_mode = #tpu.pipeline_mode<synchronous>, transform_indices = @transform_3, window_bounds = array<i64: 128, 384>}, {pipeline_mode = #tpu.pipeline_mode<synchronous>, transform_indices = @transform_4, window_bounds = array<i64: 128, 128>}, {pipeline_mode = #tpu.pipeline_mode<synchronous>, transform_indices = @transform_5, window_bounds = array<i64: 128, 256>}, {pipeline_mode = #tpu.pipeline_mode<synchronous>, transform_indices = @transform_6, window_bounds = array<i64: 256, 128>}, {pipeline_mode = #tpu.pipeline_mode<synchronous>, transform_indices = @transform_7, window_bounds = array<i64: 128, 128>}, {pipeline_mode = #tpu.pipeline_mode<synchronous>, transform_indices = @transform_8, window_bounds = array<i64: 1, 128>}, {pipeline_mode = #tpu.pipeline_mode<synchronous>, transform_indices = @transform_9, window_bounds = array<i64: 8, 128>}, {transform_indices = @transform_10, window_bounds = array<i64: 8, 128>}]} {
    %c0 = arith.constant 0 : index
    %c0_0 = arith.constant 0 : index
    %0 = vector.load %arg10[%c0, %c0_0] : memref<8x128xf32, #tpu.memory_space<vmem>>, vector<8x128xf32>
    %1 = vector.extract_strided_slice %0 {offsets = [0, 0], sizes = [1, 128], strides = [1, 1]} : vector<8x128xf32> to vector<1x128xf32>
    %2 = vector.extract_strided_slice %0 {offsets = [1, 0], sizes = [1, 128], strides = [1, 1]} : vector<8x128xf32> to vector<1x128xf32>
    %3 = vector.extract_strided_slice %0 {offsets = [2, 0], sizes = [1, 128], strides = [1, 1]} : vector<8x128xf32> to vector<1x128xf32>
    %4 = vector.extract_strided_slice %0 {offsets = [3, 0], sizes = [1, 128], strides = [1, 1]} : vector<8x128xf32> to vector<1x128xf32>
    %5 = vector.extract_strided_slice %0 {offsets = [4, 0], sizes = [1, 128], strides = [1, 1]} : vector<8x128xf32> to vector<1x128xf32>
    %6 = vector.extract_strided_slice %0 {offsets = [5, 0], sizes = [1, 128], strides = [1, 1]} : vector<8x128xf32> to vector<1x128xf32>
    %7 = vector.extract_strided_slice %0 {offsets = [6, 0], sizes = [2, 128], strides = [1, 1]} : vector<8x128xf32> to vector<2x128xf32>
    %8 = vector.shape_cast %7 : vector<2x128xf32> to vector<1x256xf32>
    %c0_1 = arith.constant 0 : index
    %c0_2 = arith.constant 0 : index
    %9 = vector.load %arg1[%c0_1, %c0_2] : memref<32x128xbf16, #tpu.memory_space<vmem>>, vector<32x128xbf16>
    %c0_3 = arith.constant 0 : index
    %c0_4 = arith.constant 0 : index
    %10 = vector.load %arg3[%c0_3, %c0_4] : memref<128x128xbf16, #tpu.memory_space<vmem>>, vector<128x128xbf16>
    %cst = arith.constant dense<0.000000e+00> : vector<32x128xf32>
    %11 = tpu.matmul %9, %10, %cst {dimension_numbers = #tpu.dot_dimension_numbers<[1], [0], [0], [1], [0, 0, 1, 1], [], []>} : vector<32x128xbf16>, vector<128x128xbf16>, vector<32x128xf32> -> vector<32x128xf32>
    %12 = vector.broadcast %1 : vector<1x128xf32> to vector<32x128xf32>
    %13 = arith.addf %11, %12 : vector<32x128xf32>
    %14 = vector.shape_cast %13 : vector<32x128xf32> to vector<2x16x128xf32>
    %c0_5 = arith.constant 0 : index
    %c0_6 = arith.constant 0 : index
    %15 = vector.load %arg2[%c0_5, %c0_6] : memref<16x128xf32, #tpu.memory_space<vmem>>, vector<16x128xf32>
    %16 = vector.shape_cast %15 : vector<16x128xf32> to vector<1x16x128xf32>
    %17 = vector.broadcast %16 : vector<1x16x128xf32> to vector<2x16x128xf32>
    %18 = arith.addf %14, %17 : vector<2x16x128xf32>
    %19 = vector.shape_cast %18 : vector<2x16x128xf32> to vector<32x128xf32>
    %cst_7 = arith.constant dense<0.000000e+00> : vector<32xf32>
    %20 = vector.multi_reduction <add>, %19, %cst_7 [1] : vector<32x128xf32> to vector<32xf32>
    %21 = vector.shape_cast %20 : vector<32xf32> to vector<32x1xf32>
    %cst_8 = arith.constant 1.280000e+02 : f32
    %22 = vector.broadcast %cst_8 : f32 to vector<32x1xf32>
    %23 = arith.divf %21, %22 : vector<32x1xf32>
    %24 = vector.broadcast %23 : vector<32x1xf32> to vector<32x128xf32>
    %25 = arith.subf %19, %24 : vector<32x128xf32>
    %26 = vector.broadcast %23 : vector<32x1xf32> to vector<32x128xf32>
    %27 = arith.subf %19, %26 : vector<32x128xf32>
    %28 = arith.mulf %25, %27 : vector<32x128xf32>
    %cst_9 = arith.constant dense<0.000000e+00> : vector<32xf32>
    %29 = vector.multi_reduction <add>, %28, %cst_9 [1] : vector<32x128xf32> to vector<32xf32>
    %30 = vector.shape_cast %29 : vector<32xf32> to vector<32x1xf32>
    %cst_10 = arith.constant 1.280000e+02 : f32
    %31 = vector.broadcast %cst_10 : f32 to vector<32x1xf32>
    %32 = arith.divf %30, %31 : vector<32x1xf32>
    %33 = vector.broadcast %23 : vector<32x1xf32> to vector<32x128xf32>
    %34 = arith.subf %19, %33 : vector<32x128xf32>
    %cst_11 = arith.constant 9.99999974E-6 : f32
    %35 = vector.broadcast %cst_11 : f32 to vector<32x1xf32>
    %36 = arith.addf %32, %35 : vector<32x1xf32>
    %37 = math.rsqrt %36 : vector<32x1xf32>
    %38 = vector.broadcast %37 : vector<32x1xf32> to vector<32x128xf32>
    %39 = arith.mulf %34, %38 : vector<32x128xf32>
    %40 = vector.broadcast %2 : vector<1x128xf32> to vector<32x128xf32>
    %41 = arith.mulf %39, %40 : vector<32x128xf32>
    %42 = vector.broadcast %3 : vector<1x128xf32> to vector<32x128xf32>
    %43 = arith.addf %41, %42 : vector<32x128xf32>
    %44 = arith.truncf %43 : vector<32x128xf32> to vector<32x128xbf16>
    %c0_12 = arith.constant 0 : index
    %c0_13 = arith.constant 0 : index
    %45 = vector.load %arg4[%c0_12, %c0_13] : memref<128x384xbf16, #tpu.memory_space<vmem>>, vector<128x384xbf16>
    %cst_14 = arith.constant dense<0.000000e+00> : vector<32x384xf32>
    %46 = tpu.matmul %44, %45, %cst_14 {dimension_numbers = #tpu.dot_dimension_numbers<[1], [0], [0], [1], [0, 0, 1, 1], [], []>} : vector<32x128xbf16>, vector<128x384xbf16>, vector<32x384xf32> -> vector<32x384xf32>
    %47 = arith.truncf %46 : vector<32x384xf32> to vector<32x384xbf16>
    %48 = vector.extract_strided_slice %47 {offsets = [0, 0], sizes = [32, 128], strides = [1, 1]} : vector<32x384xbf16> to vector<32x128xbf16>
    %49 = vector.shape_cast %48 : vector<32x128xbf16> to vector<2x16x128xbf16>
    %50 = vector.extract_strided_slice %47 {offsets = [0, 128], sizes = [32, 128], strides = [1, 1]} : vector<32x384xbf16> to vector<32x128xbf16>
    %51 = vector.shape_cast %50 : vector<32x128xbf16> to vector<2x16x128xbf16>
    %52 = vector.extract_strided_slice %47 {offsets = [0, 256], sizes = [32, 128], strides = [1, 1]} : vector<32x384xbf16> to vector<32x128xbf16>
    %53 = vector.shape_cast %52 : vector<32x128xbf16> to vector<2x16x128xbf16>
    "tpu.trace_start"() <{level = 10 : i32, message = "bqd,bkd->bqk"}> : () -> ()
    %cst_15 = arith.constant dense<0.000000e+00> : vector<2x16x16xf32>
    %54 = tpu.matmul %49, %51, %cst_15 {dimension_numbers = #tpu.dot_dimension_numbers<[2], [2], [1], [1], [0, 0, 0, 1, 1, 1], [0], [0]>} : vector<2x16x128xbf16>, vector<2x16x128xbf16>, vector<2x16x16xf32> -> vector<2x16x16xf32>
    "tpu.trace_stop"() : () -> ()
    %cst_16 = arith.constant dense<0xFF800000> : vector<2x16xf32>
    %55 = vector.multi_reduction <maximumf>, %54, %cst_16 [2] : vector<2x16x16xf32> to vector<2x16xf32>
    %56 = vector.shape_cast %55 : vector<2x16xf32> to vector<2x16x1xf32>
    %57 = vector.broadcast %56 : vector<2x16x1xf32> to vector<2x16x16xf32>
    %58 = arith.subf %54, %57 : vector<2x16x16xf32>
    %59 = math.exp %58 : vector<2x16x16xf32>
    %cst_17 = arith.constant dense<0.000000e+00> : vector<2x16xf32>
    %60 = vector.multi_reduction <add>, %59, %cst_17 [2] : vector<2x16x16xf32> to vector<2x16xf32>
    %61 = vector.shape_cast %60 : vector<2x16xf32> to vector<2x16x1xf32>
    %62 = tpu.reciprocal %61 {approx = true} : vector<2x16x1xf32> -> vector<2x16x1xf32>
    %63 = vector.broadcast %62 : vector<2x16x1xf32> to vector<2x16x16xf32>
    %64 = arith.mulf %59, %63 : vector<2x16x16xf32>
    %65 = arith.truncf %64 : vector<2x16x16xf32> to vector<2x16x16xbf16>
    "tpu.trace_start"() <{level = 10 : i32, message = "bqk,bkd->bqd"}> : () -> ()
    %cst_18 = arith.constant dense<0.000000e+00> : vector<2x16x128xf32>
    %66 = tpu.matmul %65, %53, %cst_18 {dimension_numbers = #tpu.dot_dimension_numbers<[2], [1], [1], [2], [0, 0, 0, 1, 1, 2], [0], [0]>} : vector<2x16x16xbf16>, vector<2x16x128xbf16>, vector<2x16x128xf32> -> vector<2x16x128xf32>
    "tpu.trace_stop"() : () -> ()
    %67 = vector.shape_cast %66 : vector<2x16x128xf32> to vector<32x128xf32>
    %68 = arith.truncf %67 : vector<32x128xf32> to vector<32x128xbf16>
    %c0_19 = arith.constant 0 : index
    %c0_20 = arith.constant 0 : index
    %69 = vector.load %arg5[%c0_19, %c0_20] : memref<128x128xbf16, #tpu.memory_space<vmem>>, vector<128x128xbf16>
    %cst_21 = arith.constant dense<0.000000e+00> : vector<32x128xf32>
    %70 = tpu.matmul %68, %69, %cst_21 {dimension_numbers = #tpu.dot_dimension_numbers<[1], [0], [0], [1], [0, 0, 1, 1], [], []>} : vector<32x128xbf16>, vector<128x128xbf16>, vector<32x128xf32> -> vector<32x128xf32>
    %71 = arith.addf %19, %70 : vector<32x128xf32>
    %cst_22 = arith.constant dense<0.000000e+00> : vector<32xf32>
    %72 = vector.multi_reduction <add>, %71, %cst_22 [1] : vector<32x128xf32> to vector<32xf32>
    %73 = vector.shape_cast %72 : vector<32xf32> to vector<32x1xf32>
    %cst_23 = arith.constant 1.280000e+02 : f32
    %74 = vector.broadcast %cst_23 : f32 to vector<32x1xf32>
    %75 = arith.divf %73, %74 : vector<32x1xf32>
    %76 = vector.broadcast %75 : vector<32x1xf32> to vector<32x128xf32>
    %77 = arith.subf %71, %76 : vector<32x128xf32>
    %78 = vector.broadcast %75 : vector<32x1xf32> to vector<32x128xf32>
    %79 = arith.subf %71, %78 : vector<32x128xf32>
    %80 = arith.mulf %77, %79 : vector<32x128xf32>
    %cst_24 = arith.constant dense<0.000000e+00> : vector<32xf32>
    %81 = vector.multi_reduction <add>, %80, %cst_24 [1] : vector<32x128xf32> to vector<32xf32>
    %82 = vector.shape_cast %81 : vector<32xf32> to vector<32x1xf32>
    %cst_25 = arith.constant 1.280000e+02 : f32
    %83 = vector.broadcast %cst_25 : f32 to vector<32x1xf32>
    %84 = arith.divf %82, %83 : vector<32x1xf32>
    %85 = vector.broadcast %75 : vector<32x1xf32> to vector<32x128xf32>
    %86 = arith.subf %71, %85 : vector<32x128xf32>
    %cst_26 = arith.constant 9.99999974E-6 : f32
    %87 = vector.broadcast %cst_26 : f32 to vector<32x1xf32>
    %88 = arith.addf %84, %87 : vector<32x1xf32>
    %89 = math.rsqrt %88 : vector<32x1xf32>
    %90 = vector.broadcast %89 : vector<32x1xf32> to vector<32x128xf32>
    %91 = arith.mulf %86, %90 : vector<32x128xf32>
    %92 = vector.broadcast %4 : vector<1x128xf32> to vector<32x128xf32>
    %93 = arith.mulf %91, %92 : vector<32x128xf32>
    %94 = vector.broadcast %5 : vector<1x128xf32> to vector<32x128xf32>
    %95 = arith.addf %93, %94 : vector<32x128xf32>
    %96 = arith.truncf %95 : vector<32x128xf32> to vector<32x128xbf16>
    %c0_27 = arith.constant 0 : index
    %c0_28 = arith.constant 0 : index
    %97 = vector.load %arg6[%c0_27, %c0_28] : memref<128x256xbf16, #tpu.memory_space<vmem>>, vector<128x256xbf16>
    %cst_29 = arith.constant dense<0.000000e+00> : vector<32x256xf32>
    %98 = tpu.matmul %96, %97, %cst_29 {dimension_numbers = #tpu.dot_dimension_numbers<[1], [0], [0], [1], [0, 0, 1, 1], [], []>} : vector<32x128xbf16>, vector<128x256xbf16>, vector<32x256xf32> -> vector<32x256xf32>
    %99 = vector.broadcast %8 : vector<1x256xf32> to vector<32x256xf32>
    %100 = arith.addf %98, %99 : vector<32x256xf32>
    %101 = arith.mulf %100, %100 : vector<32x256xf32>
    %102 = arith.mulf %100, %101 : vector<32x256xf32>
    %cst_30 = arith.constant 4.471500e-02 : f32
    %103 = vector.broadcast %cst_30 : f32 to vector<32x256xf32>
    %104 = arith.mulf %103, %102 : vector<32x256xf32>
    %105 = arith.addf %100, %104 : vector<32x256xf32>
    %cst_31 = arith.constant 0.797884583 : f32
    %106 = vector.broadcast %cst_31 : f32 to vector<32x256xf32>
    %107 = arith.mulf %106, %105 : vector<32x256xf32>
    %108 = math.tanh %107 : vector<32x256xf32>
    %cst_32 = arith.constant 1.000000e+00 : f32
    %109 = vector.broadcast %cst_32 : f32 to vector<32x256xf32>
    %110 = arith.addf %109, %108 : vector<32x256xf32>
    %cst_33 = arith.constant 5.000000e-01 : f32
    %111 = vector.broadcast %cst_33 : f32 to vector<32x256xf32>
    %112 = arith.mulf %111, %110 : vector<32x256xf32>
    %113 = arith.mulf %100, %112 : vector<32x256xf32>
    %114 = arith.truncf %113 : vector<32x256xf32> to vector<32x256xbf16>
    %c0_34 = arith.constant 0 : index
    %c0_35 = arith.constant 0 : index
    %115 = vector.load %arg7[%c0_34, %c0_35] : memref<256x128xbf16, #tpu.memory_space<vmem>>, vector<256x128xbf16>
    %cst_36 = arith.constant dense<0.000000e+00> : vector<32x128xf32>
    %116 = tpu.matmul %114, %115, %cst_36 {dimension_numbers = #tpu.dot_dimension_numbers<[1], [0], [0], [1], [0, 0, 1, 1], [], []>} : vector<32x256xbf16>, vector<256x128xbf16>, vector<32x128xf32> -> vector<32x128xf32>
    %117 = arith.addf %71, %116 : vector<32x128xf32>
    %118 = vector.broadcast %6 : vector<1x128xf32> to vector<32x128xf32>
    %119 = arith.addf %117, %118 : vector<32x128xf32>
    %120 = vector.shape_cast %119 : vector<32x128xf32> to vector<8x4x128xf32>
    %cst_37 = arith.constant dense<0.000000e+00> : vector<8x128xf32>
    %121 = vector.multi_reduction <add>, %120, %cst_37 [1] : vector<8x4x128xf32> to vector<8x128xf32>
    %cst_38 = arith.constant 4.000000e+00 : f32
    %122 = vector.broadcast %cst_38 : f32 to vector<8x128xf32>
    %123 = arith.divf %121, %122 : vector<8x128xf32>
    %124 = arith.truncf %123 : vector<8x128xf32> to vector<8x128xbf16>
    %c0_39 = arith.constant 0 : index
    %c0_40 = arith.constant 0 : index
    %125 = vector.load %arg8[%c0_39, %c0_40] : memref<128x128xbf16, #tpu.memory_space<vmem>>, vector<128x128xbf16>
    %cst_41 = arith.constant dense<0.000000e+00> : vector<8x128xf32>
    %126 = tpu.matmul %124, %125, %cst_41 {dimension_numbers = #tpu.dot_dimension_numbers<[1], [0], [0], [1], [0, 0, 1, 1], [], []>} : vector<8x128xbf16>, vector<128x128xbf16>, vector<8x128xf32> -> vector<8x128xf32>
    %c0_42 = arith.constant 0 : index
    %c0_43 = arith.constant 0 : index
    %127 = vector.load %arg9[%c0_42, %c0_43] : memref<1x128xf32, #tpu.memory_space<vmem>>, vector<1x128xf32>
    %128 = vector.broadcast %127 : vector<1x128xf32> to vector<8x128xf32>
    %129 = arith.addf %126, %128 : vector<8x128xf32>
    %c0_44 = arith.constant 0 : index
    %c0_45 = arith.constant 0 : index
    %130 = vector.load %arg11[%c0_44, %c0_45] : memref<8x128xf32, #tpu.memory_space<vmem>>, vector<8x128xf32>
    tpu.vector_store %arg11[%c0_44, %c0_45], %129 {strides = array<i32>} : memref<8x128xf32, #tpu.memory_space<vmem>>, vector<8x128xf32>,
    return
  }
  func.func @transform_0(%arg0: i32) -> (i32, i32) {
    %c0_i32 = arith.constant 0 : i32
    %c0_i32_0 = arith.constant 0 : i32
    return %arg0, %c0_i32 : i32, i32
  }
  func.func @transform_1(%arg0: i32) -> (i32, i32) {
    %c0_i32 = arith.constant 0 : i32
    %c0_i32_0 = arith.constant 0 : i32
    %c0_i32_1 = arith.constant 0 : i32
    return %c0_i32, %c0_i32_0 : i32, i32
  }
  func.func @transform_2(%arg0: i32) -> (i32, i32) {
    %c0_i32 = arith.constant 0 : i32
    %c0_i32_0 = arith.constant 0 : i32
    %c0_i32_1 = arith.constant 0 : i32
    return %c0_i32, %c0_i32_0 : i32, i32
  }
  func.func @transform_3(%arg0: i32) -> (i32, i32) {
    %c0_i32 = arith.constant 0 : i32
    %c0_i32_0 = arith.constant 0 : i32
    %c0_i32_1 = arith.constant 0 : i32
    return %c0_i32, %c0_i32_0 : i32, i32
  }
  func.func @transform_4(%arg0: i32) -> (i32, i32) {
    %c0_i32 = arith.constant 0 : i32
    %c0_i32_0 = arith.constant 0 : i32
    %c0_i32_1 = arith.constant 0 : i32
    return %c0_i32, %c0_i32_0 : i32, i32
  }
  func.func @transform_5(%arg0: i32) -> (i32, i32) {
    %c0_i32 = arith.constant 0 : i32
    %c0_i32_0 = arith.constant 0 : i32
    %c0_i32_1 = arith.constant 0 : i32
    return %c0_i32, %c0_i32_0 : i32, i32
  }
  func.func @transform_6(%arg0: i32) -> (i32, i32) {
    %c0_i32 = arith.constant 0 : i32
    %c0_i32_0 = arith.constant 0 : i32
    %c0_i32_1 = arith.constant 0 : i32
    return %c0_i32, %c0_i32_0 : i32, i32
  }
  func.func @transform_7(%arg0: i32) -> (i32, i32) {
    %c0_i32 = arith.constant 0 : i32
    %c0_i32_0 = arith.constant 0 : i32
    %c0_i32_1 = arith.constant 0 : i32
    return %c0_i32, %c0_i32_0 : i32, i32
  }
  func.func @transform_8(%arg0: i32) -> (i32, i32) {
    %c0_i32 = arith.constant 0 : i32
    %c0_i32_0 = arith.constant 0 : i32
    %c0_i32_1 = arith.constant 0 : i32
    return %c0_i32, %c0_i32_0 : i32, i32
  }
  func.func @transform_9(%arg0: i32) -> (i32, i32) {
    %c0_i32 = arith.constant 0 : i32
    %c0_i32_0 = arith.constant 0 : i32
    %c0_i32_1 = arith.constant 0 : i32
    return %c0_i32, %c0_i32_0 : i32, i32
  }
  func.func @transform_10(%arg0: i32) -> (i32, i32) {
    %c0_i32 = arith.constant 0 : i32
    %c0_i32_0 = arith.constant 0 : i32
    return %arg0, %c0_i32 : i32, i32
  }
}

module attributes {stable_mosaic.version = 11 : i64} {
  func.func @vit_kernel(%arg0: i32, %arg1: memref<32x128xbf16, #tpu.memory_space<vmem>>, %arg2: memref<16x128xf32, #tpu.memory_space<vmem>>, %arg3: memref<128x128xbf16, #tpu.memory_space<vmem>>, %arg4: memref<128x384xbf16, #tpu.memory_space<vmem>>, %arg5: memref<128x128xbf16, #tpu.memory_space<vmem>>, %arg6: memref<128x256xbf16, #tpu.memory_space<vmem>>, %arg7: memref<256x128xbf16, #tpu.memory_space<vmem>>, %arg8: memref<128x128xbf16, #tpu.memory_space<vmem>>, %arg9: memref<1x128xf32, #tpu.memory_space<vmem>>, %arg10: memref<8x128xf32, #tpu.memory_space<vmem>>, %arg11: memref<8x128xf32, #tpu.memory_space<vmem>>) attributes {dimension_semantics = [#tpu.dimension_semantics<parallel>], iteration_bounds = array<i64: 1>, scalar_prefetch = 0 : i64, scratch_operands = 0 : i64, tpu.core_type = #tpu.core_type<tc>, window_params = [{transform_indices = @transform_0, window_bounds = array<i64: 32, 128>}, {pipeline_mode = #tpu.pipeline_mode<synchronous>, transform_indices = @transform_1, window_bounds = array<i64: 16, 128>}, {pipeline_mode = #tpu.pipeline_mode<synchronous>, transform_indices = @transform_2, window_bounds = array<i64: 128, 128>}, {pipeline_mode = #tpu.pipeline_mode<synchronous>, transform_indices = @transform_3, window_bounds = array<i64: 128, 384>}, {pipeline_mode = #tpu.pipeline_mode<synchronous>, transform_indices = @transform_4, window_bounds = array<i64: 128, 128>}, {pipeline_mode = #tpu.pipeline_mode<synchronous>, transform_indices = @transform_5, window_bounds = array<i64: 128, 256>}, {pipeline_mode = #tpu.pipeline_mode<synchronous>, transform_indices = @transform_6, window_bounds = array<i64: 256, 128>}, {pipeline_mode = #tpu.pipeline_mode<synchronous>, transform_indices = @transform_7, window_bounds = array<i64: 128, 128>}, {pipeline_mode = #tpu.pipeline_mode<synchronous>, transform_indices = @transform_8, window_bounds = array<i64: 1, 128>}, {pipeline_mode = #tpu.pipeline_mode<synchronous>, transform_indices = @transform_9, window_bounds = array<i64: 8, 128>}, {transform_indices = @transform_10, window_bounds = array<i64: 8, 128>}]} {
    %c0 = arith.constant 0 : index
    %c0_0 = arith.constant 0 : index
    %0 = vector.load %arg10[%c0, %c0_0] : memref<8x128xf32, #tpu.memory_space<vmem>>, vector<8x128xf32>
    %1 = vector.extract_strided_slice %0 {offsets = [0, 0], sizes = [1, 128], strides = [1, 1]} : vector<8x128xf32> to vector<1x128xf32>
    %2 = vector.extract_strided_slice %0 {offsets = [1, 0], sizes = [1, 128], strides = [1, 1]} : vector<8x128xf32> to vector<1x128xf32>
    %3 = vector.extract_strided_slice %0 {offsets = [2, 0], sizes = [1, 128], strides = [1, 1]} : vector<8x128xf32> to vector<1x128xf32>
    %4 = vector.extract_strided_slice %0 {offsets = [3, 0], sizes = [1, 128], strides = [1, 1]} : vector<8x128xf32> to vector<1x128xf32>
    %5 = vector.extract_strided_slice %0 {offsets = [4, 0], sizes = [1, 128], strides = [1, 1]} : vector<8x128xf32> to vector<1x128xf32>
    %6 = vector.extract_strided_slice %0 {offsets = [5, 0], sizes = [1, 128], strides = [1, 1]} : vector<8x128xf32> to vector<1x128xf32>
    %7 = vector.extract_strided_slice %0 {offsets = [6, 0], sizes = [2, 128], strides = [1, 1]} : vector<8x128xf32> to vector<2x128xf32>
    %8 = vector.shape_cast %7 : vector<2x128xf32> to vector<1x256xf32>
    %c0_1 = arith.constant 0 : index
    %c0_2 = arith.constant 0 : index
    %9 = vector.load %arg1[%c0_1, %c0_2] : memref<32x128xbf16, #tpu.memory_space<vmem>>, vector<32x128xbf16>
    %c0_3 = arith.constant 0 : index
    %c0_4 = arith.constant 0 : index
    %10 = vector.load %arg3[%c0_3, %c0_4] : memref<128x128xbf16, #tpu.memory_space<vmem>>, vector<128x128xbf16>
    %cst = arith.constant dense<0.000000e+00> : vector<32x128xf32>
    %11 = tpu.matmul %9, %10, %cst {dimension_numbers = #tpu.dot_dimension_numbers<[1], [0], [0], [1], [0, 0, 1, 1], [], []>} : vector<32x128xbf16>, vector<128x128xbf16>, vector<32x128xf32> -> vector<32x128xf32>
    %12 = vector.broadcast %1 : vector<1x128xf32> to vector<32x128xf32>
    %13 = arith.addf %11, %12 : vector<32x128xf32>
    %14 = vector.shape_cast %13 : vector<32x128xf32> to vector<2x16x128xf32>
    %c0_5 = arith.constant 0 : index
    %c0_6 = arith.constant 0 : index
    %15 = vector.load %arg2[%c0_5, %c0_6] : memref<16x128xf32, #tpu.memory_space<vmem>>, vector<16x128xf32>
    %16 = vector.shape_cast %15 : vector<16x128xf32> to vector<1x16x128xf32>
    %17 = vector.broadcast %16 : vector<1x16x128xf32> to vector<2x16x128xf32>
    %18 = arith.addf %14, %17 : vector<2x16x128xf32>
    %19 = vector.shape_cast %18 : vector<2x16x128xf32> to vector<32x128xf32>
    %cst_7 = arith.constant dense<0.000000e+00> : vector<32xf32>
    %20 = vector.multi_reduction <add>, %19, %cst_7 [1] : vector<32x128xf32> to vector<32xf32>
    %21 = vector.shape_cast %20 : vector<32xf32> to vector<32x1xf32>
    %cst_8 = arith.constant 1.280000e+02 : f32
    %22 = vector.broadcast %cst_8 : f32 to vector<32x1xf32>
    %23 = arith.divf %21, %22 : vector<32x1xf32>
    %24 = vector.broadcast %23 : vector<32x1xf32> to vector<32x128xf32>
    %25 = arith.subf %19, %24 : vector<32x128xf32>
    %26 = vector.broadcast %23 : vector<32x1xf32> to vector<32x128xf32>
    %27 = arith.subf %19, %26 : vector<32x128xf32>
    %28 = arith.mulf %25, %27 : vector<32x128xf32>
    %cst_9 = arith.constant dense<0.000000e+00> : vector<32xf32>
    %29 = vector.multi_reduction <add>, %28, %cst_9 [1] : vector<32x128xf32> to vector<32xf32>
    %30 = vector.shape_cast %29 : vector<32xf32> to vector<32x1xf32>
    %cst_10 = arith.constant 1.280000e+02 : f32
    %31 = vector.broadcast %cst_10 : f32 to vector<32x1xf32>
    %32 = arith.divf %30, %31 : vector<32x1xf32>
    %33 = vector.broadcast %23 : vector<32x1xf32> to vector<32x128xf32>
    %34 = arith.subf %19, %33 : vector<32x128xf32>
    %cst_11 = arith.constant 9.99999974E-6 : f32
    %35 = vector.broadcast %cst_11 : f32 to vector<32x1xf32>
    %36 = arith.addf %32, %35 : vector<32x1xf32>
    %37 = math.rsqrt %36 : vector<32x1xf32>
    %38 = vector.broadcast %37 : vector<32x1xf32> to vector<32x128xf32>
    %39 = arith.mulf %34, %38 : vector<32x128xf32>
    %40 = vector.broadcast %2 : vector<1x128xf32> to vector<32x128xf32>
    %41 = arith.mulf %39, %40 : vector<32x128xf32>
    %42 = vector.broadcast %3 : vector<1x128xf32> to vector<32x128xf32>
    %43 = arith.addf %41, %42 : vector<32x128xf32>
    %44 = arith.truncf %43 : vector<32x128xf32> to vector<32x128xbf16>
    %c0_12 = arith.constant 0 : index
    %c0_13 = arith.constant 0 : index
    %45 = vector.load %arg4[%c0_12, %c0_13] : memref<128x384xbf16, #tpu.memory_space<vmem>>, vector<128x384xbf16>
    %cst_14 = arith.constant dense<0.000000e+00> : vector<32x384xf32>
    %46 = tpu.matmul %44, %45, %cst_14 {dimension_numbers = #tpu.dot_dimension_numbers<[1], [0], [0], [1], [0, 0, 1, 1], [], []>} : vector<32x128xbf16>, vector<128x384xbf16>, vector<32x384xf32> -> vector<32x384xf32>
    %47 = arith.truncf %46 : vector<32x384xf32> to vector<32x384xbf16>
    %48 = vector.extract_strided_slice %47 {offsets = [0, 0], sizes = [32, 128], strides = [1, 1]} : vector<32x384xbf16> to vector<32x128xbf16>
    %49 = vector.shape_cast %48 : vector<32x128xbf16> to vector<2x16x128xbf16>
    %50 = vector.extract_strided_slice %47 {offsets = [0, 128], sizes = [32, 128], strides = [1, 1]} : vector<32x384xbf16> to vector<32x128xbf16>
    %51 = vector.shape_cast %50 : vector<32x128xbf16> to vector<2x16x128xbf16>
    %52 = vector.extract_strided_slice %47 {offsets = [0, 256], sizes = [32, 128], strides = [1, 1]} : vector<32x384xbf16> to vector<32x128xbf16>
    %53 = vector.shape_cast %52 : vector<32x128xbf16> to vector<2x16x128xbf16>
    "tpu.trace_start"() <{level = 10 : i32, message = "bqd,bkd->bqk"}> : () -> ()
    %cst_15 = arith.constant dense<0.000000e+00> : vector<2x16x16xf32>
    %54 = tpu.matmul %49, %51, %cst_15 {dimension_numbers = #tpu.dot_dimension_numbers<[2], [2], [1], [1], [0, 0, 0, 1, 1, 1], [0], [0]>} : vector<2x16x128xbf16>, vector<2x16x128xbf16>, vector<2x16x16xf32> -> vector<2x16x16xf32>
    "tpu.trace_stop"() : () -> ()
    %cst_16 = arith.constant dense<0xFF800000> : vector<2x16xf32>
    %55 = vector.multi_reduction <maximumf>, %54, %cst_16 [2] : vector<2x16x16xf32> to vector<2x16xf32>
    %56 = vector.shape_cast %55 : vector<2x16xf32> to vector<2x16x1xf32>
    %57 = vector.broadcast %56 : vector<2x16x1xf32> to vector<2x16x16xf32>
    %58 = arith.subf %54, %57 : vector<2x16x16xf32>
    %59 = math.exp %58 : vector<2x16x16xf32>
    %cst_17 = arith.constant dense<0.000000e+00> : vector<2x16xf32>
    %60 = vector.multi_reduction <add>, %59, %cst_17 [2] : vector<2x16x16xf32> to vector<2x16xf32>
    %61 = vector.shape_cast %60 : vector<2x16xf32> to vector<2x16x1xf32>
    %62 = tpu.reciprocal %61 {approx = true} : vector<2x16x1xf32> -> vector<2x16x1xf32>
    %63 = vector.broadcast %62 : vector<2x16x1xf32> to vector<2x16x16xf32>
    %64 = arith.mulf %59, %63 : vector<2x16x16xf32>
    %65 = arith.truncf %64 : vector<2x16x16xf32> to vector<2x16x16xbf16>
    "tpu.trace_start"() <{level = 10 : i32, message = "bqk,bkd->bqd"}> : () -> ()
    %cst_18 = arith.constant dense<0.000000e+00> : vector<2x16x128xf32>
    %66 = tpu.matmul %65, %53, %cst_18 {dimension_numbers = #tpu.dot_dimension_numbers<[2], [1], [1], [2], [0, 0, 0, 1, 1, 2], [0], [0]>} : vector<2x16x16xbf16>, vector<2x16x128xbf16>, vector<2x16x128xf32> -> vector<2x16x128xf32>
    "tpu.trace_stop"() : () -> ()
    %67 = vector.shape_cast %66 : vector<2x16x128xf32> to vector<32x128xf32>
    %68 = arith.truncf %67 : vector<32x128xf32> to vector<32x128xbf16>
    %c0_19 = arith.constant 0 : index
    %c0_20 = arith.constant 0 : index
    %69 = vector.load %arg5[%c0_19, %c0_20] : memref<128x128xbf16, #tpu.memory_space<vmem>>, vector<128x128xbf16>
    %cst_21 = arith.constant dense<0.000000e+00> : vector<32x128xf32>
    %70 = tpu.matmul %68, %69, %cst_21 {dimension_numbers = #tpu.dot_dimension_numbers<[1], [0], [0], [1], [0, 0, 1, 1], [], []>} : vector<32x128xbf16>, vector<128x128xbf16>, vector<32x128xf32> -> vector<32x128xf32>
    %71 = arith.addf %19, %70 : vector<32x128xf32>
    %cst_22 = arith.constant dense<0.000000e+00> : vector<32xf32>
    %72 = vector.multi_reduction <add>, %71, %cst_22 [1] : vector<32x128xf32> to vector<32xf32>
    %73 = vector.shape_cast %72 : vector<32xf32> to vector<32x1xf32>
    %cst_23 = arith.constant 1.280000e+02 : f32
    %74 = vector.broadcast %cst_23 : f32 to vector<32x1xf32>
    %75 = arith.divf %73, %74 : vector<32x1xf32>
    %76 = vector.broadcast %75 : vector<32x1xf32> to vector<32x128xf32>
    %77 = arith.subf %71, %76 : vector<32x128xf32>
    %78 = vector.broadcast %75 : vector<32x1xf32> to vector<32x128xf32>
    %79 = arith.subf %71, %78 : vector<32x128xf32>
    %80 = arith.mulf %77, %79 : vector<32x128xf32>
    %cst_24 = arith.constant dense<0.000000e+00> : vector<32xf32>
    %81 = vector.multi_reduction <add>, %80, %cst_24 [1] : vector<32x128xf32> to vector<32xf32>
    %82 = vector.shape_cast %81 : vector<32xf32> to vector<32x1xf32>
    %cst_25 = arith.constant 1.280000e+02 : f32
    %83 = vector.broadcast %cst_25 : f32 to vector<32x1xf32>
    %84 = arith.divf %82, %83 : vector<32x1xf32>
    %85 = vector.broadcast %75 : vector<32x1xf32> to vector<32x128xf32>
    %86 = arith.subf %71, %85 : vector<32x128xf32>
    %cst_26 = arith.constant 9.99999974E-6 : f32
    %87 = vector.broadcast %cst_26 : f32 to vector<32x1xf32>
    %88 = arith.addf %84, %87 : vector<32x1xf32>
    %89 = math.rsqrt %88 : vector<32x1xf32>
    %90 = vector.broadcast %89 : vector<32x1xf32> to vector<32x128xf32>
    %91 = arith.mulf %86, %90 : vector<32x128xf32>
    %92 = vector.broadcast %4 : vector<1x128xf32> to vector<32x128xf32>
    %93 = arith.mulf %91, %92 : vector<32x128xf32>
    %94 = vector.broadcast %5 : vector<1x128xf32> to vector<32x128xf32>
    %95 = arith.addf %93, %94 : vector<32x128xf32>
    %96 = arith.truncf %95 : vector<32x128xf32> to vector<32x128xbf16>
    %c0_27 = arith.constant 0 : index
    %c0_28 = arith.constant 0 : index
    %97 = vector.load %arg6[%c0_27, %c0_28] : memref<128x256xbf16, #tpu.memory_space<vmem>>, vector<128x256xbf16>
    %cst_29 = arith.constant dense<0.000000e+00> : vector<32x256xf32>
    %98 = tpu.matmul %96, %97, %cst_29 {dimension_numbers = #tpu.dot_dimension_numbers<[1], [0], [0], [1], [0, 0, 1, 1], [], []>} : vector<32x128xbf16>, vector<128x256xbf16>, vector<32x256xf32> -> vector<32x256xf32>
    %99 = vector.broadcast %8 : vector<1x256xf32> to vector<32x256xf32>
    %100 = arith.addf %98, %99 : vector<32x256xf32>
    %101 = arith.mulf %100, %100 : vector<32x256xf32>
    %102 = arith.mulf %100, %101 : vector<32x256xf32>
    %cst_30 = arith.constant 4.471500e-02 : f32
    %103 = vector.broadcast %cst_30 : f32 to vector<32x256xf32>
    %104 = arith.mulf %103, %102 : vector<32x256xf32>
    %105 = arith.addf %100, %104 : vector<32x256xf32>
    %cst_31 = arith.constant 0.797884583 : f32
    %106 = vector.broadcast %cst_31 : f32 to vector<32x256xf32>
    %107 = arith.mulf %106, %105 : vector<32x256xf32>
    %108 = math.tanh %107 : vector<32x256xf32>
    %cst_32 = arith.constant 1.000000e+00 : f32
    %109 = vector.broadcast %cst_32 : f32 to vector<32x256xf32>
    %110 = arith.addf %109, %108 : vector<32x256xf32>
    %cst_33 = arith.constant 5.000000e-01 : f32
    %111 = vector.broadcast %cst_33 : f32 to vector<32x256xf32>
    %112 = arith.mulf %111, %110 : vector<32x256xf32>
    %113 = arith.mulf %100, %112 : vector<32x256xf32>
    %114 = arith.truncf %113 : vector<32x256xf32> to vector<32x256xbf16>
    %c0_34 = arith.constant 0 : index
    %c0_35 = arith.constant 0 : index
    %115 = vector.load %arg7[%c0_34, %c0_35] : memref<256x128xbf16, #tpu.memory_space<vmem>>, vector<256x128xbf16>
    %cst_36 = arith.constant dense<0.000000e+00> : vector<32x128xf32>
    %116 = tpu.matmul %114, %115, %cst_36 {dimension_numbers = #tpu.dot_dimension_numbers<[1], [0], [0], [1], [0, 0, 1, 1], [], []>} : vector<32x256xbf16>, vector<256x128xbf16>, vector<32x128xf32> -> vector<32x128xf32>
    %117 = arith.addf %71, %116 : vector<32x128xf32>
    %118 = vector.broadcast %6 : vector<1x128xf32> to vector<32x128xf32>
    %119 = arith.addf %117, %118 : vector<32x128xf32>
    %120 = vector.shape_cast %119 : vector<32x128xf32> to vector<8x4x128xf32>
    %cst_37 = arith.constant dense<0.000000e+00> : vector<8x128xf32>
    %121 = vector.multi_reduction <add>, %120, %cst_37 [1] : vector<8x4x128xf32> to vector<8x128xf32>
    %cst_38 = arith.constant 4.000000e+00 : f32
    %122 = vector.broadcast %cst_38 : f32 to vector<8x128xf32>
    %123 = arith.divf %121, %122 : vector<8x128xf32>
    %124 = arith.truncf %123 : vector<8x128xf32> to vector<8x128xbf16>
    %c0_39 = arith.constant 0 : index
    %c0_40 = arith.constant 0 : index
    %125 = vector.load %arg8[%c0_39, %c0_40] : memref<128x128xbf16, #tpu.memory_space<vmem>>, vector<128x128xbf16>
    %cst_41 = arith.constant dense<0.000000e+00> : vector<8x128xf32>
    %126 = tpu.matmul %124, %125, %cst_41 {dimension_numbers = #tpu.dot_dimension_numbers<[1], [0], [0], [1], [0, 0, 1, 1], [], []>} : vector<8x128xbf16>, vector<128x128xbf16>, vector<8x128xf32> -> vector<8x128xf32>
    %c0_42 = arith.constant 0 : index
    %c0_43 = arith.constant 0 : index
    %127 = vector.load %arg9[%c0_42, %c0_43] : memref<1x128xf32, #tpu.memory_space<vmem>>, vector<1x128xf32>
    %128 = vector.broadcast %127 : vector<1x128xf32> to vector<8x128xf32>
    %129 = arith.addf %126, %128 : vector<8x128xf32>
    %c0_44 = arith.constant 0 : index
    %c0_45 = arith.constant 0 : index
    %130 = vector.load %arg11[%c0_44, %c0_45] : memref<8x128xf32, #tpu.memory_space<vmem>>, vector<8x128xf32>
    tpu.vector_store %arg11[%c0_44, %c0_45], %129 {strides = array<i32>} : memref<8x128xf32, #tpu.memory_space<vmem>>, vector<8x128xf32>,
    return
  }
  func.func @transform_0(%arg0: i32) -> (i32, i32) {
    %c0_i32 = arith.constant 0 : i32
    %c0_i32_0 = arith.constant 0 : i32
    return %arg0, %c0_i32 : i32, i32
  }
  func.func @transform_1(%arg0: i32) -> (i32, i32) {
    %c0_i32 = arith.constant 0 : i32
    %c0_i32_0 = arith.constant 0 : i32
    %c0_i32_1 = arith.constant 0 : i32
    return %c0_i32, %c0_i32_0 : i32, i32
  }
  func.func @transform_2(%arg0: i32) -> (i32, i32) {
    %c0_i32 = arith.constant 0 : i32
    %c0_i32_0 = arith.constant 0 : i32
    %c0_i32_1 = arith.constant 0 : i32
    return %c0_i32, %c0_i32_0 : i32, i32
  }
  func.func @transform_3(%arg0: i32) -> (i32, i32) {
    %c0_i32 = arith.constant 0 : i32
    %c0_i32_0 = arith.constant 0 : i32
    %c0_i32_1 = arith.constant 0 : i32
    return %c0_i32, %c0_i32_0 : i32, i32
  }
  func.func @transform_4(%arg0: i32) -> (i32, i32) {
    %c0_i32 = arith.constant 0 : i32
    %c0_i32_0 = arith.constant 0 : i32
    %c0_i32_1 = arith.constant 0 : i32
    return %c0_i32, %c0_i32_0 : i32, i32
  }
  func.func @transform_5(%arg0: i32) -> (i32, i32) {
    %c0_i32 = arith.constant 0 : i32
    %c0_i32_0 = arith.constant 0 : i32
    %c0_i32_1 = arith.constant 0 : i32
    return %c0_i32, %c0_i32_0 : i32, i32
  }
  func.func @transform_6(%arg0: i32) -> (i32, i32) {
    %c0_i32 = arith.constant 0 : i32
    %c0_i32_0 = arith.constant 0 : i32
    %c0_i32_1 = arith.constant 0 : i32
    return %c0_i32, %c0_i32_0 : i32, i32
  }
  func.func @transform_7(%arg0: i32) -> (i32, i32) {
    %c0_i32 = arith.constant 0 : i32
    %c0_i32_0 = arith.constant 0 : i32
    %c0_i32_1 = arith.constant 0 : i32
    return %c0_i32, %c0_i32_0 : i32, i32
  }
  func.func @transform_8(%arg0: i32) -> (i32, i32) {
    %c0_i32 = arith.constant 0 : i32
    %c0_i32_0 = arith.constant 0 : i32
    %c0_i32_1 = arith.constant 0 : i32
    return %c0_i32, %c0_i32_0 : i32, i32
  }
  func.func @transform_9(%arg0: i32) -> (i32, i32) {
    %c0_i32 = arith.constant 0 : i32
    %c0_i32_0 = arith.constant 0 : i32
    %c0_i32_1 = arith.constant 0 : i32
    return %c0_i32, %c0_i32_0 : i32, i32
  }
  func.func @transform_10(%arg0: i32) -> (i32, i32) {
    %c0_i32 = arith.constant 0 : i32
    %c0_i32_0 = arith.constant 0 : i32
    return %arg0, %c0_i32 : i32, i32
  }
}

</mosaic_0001>

<bundles_post_ra>
// kernel: three_view_net_forward.2
= control target key start
LH: loop header
LB: loop body
LE: loop exit
PB: predicated region body
PF: predicated region fallthrough
CT: control target
= control target key end

     0   :  { %s2456_s13 = smov 0   ;;  %s2914_s0 = inlined_call_operand.vmem [shape: bf16[64,128], index: 0, kind: input, shape index: {}]   ;;  %s2915_s1 = inlined_call_operand.vmem [shape: f32[16,128], index: 1, kind: input, shape index: {}]   ;;  %s2916_s2 = inlined_call_operand.vmem [shape: bf16[128,128], index: 2, kind: input, shape index: {}]   ;;  %s2917_s3 = inlined_call_operand.vmem [shape: bf16[128,384], index: 3, kind: input, shape index: {}]   ;;  %s2918_s4 = inlined_call_operand.vmem [shape: bf16[128,128], index: 4, kind: input, shape index: {}]   ;;  %s2919_s5 = inlined_call_operand.vmem [shape: bf16[128,256], index: 5, kind: input, shape index: {}]   ;;  %s2920_s6 = inlined_call_operand.vmem [shape: bf16[256,128], index: 6, kind: input, shape index: {}]   ;;  %s2921_s7 = inlined_call_operand.vmem [shape: bf16[128,128], index: 7, kind: input, shape index: {}]   ;;  %s2922_s8 = inlined_call_operand.vmem [shape: f32[1,128], index: 8, kind: input, shape index: {}]   ;;  %s2923_s9 = inlined_call_operand.vmem [shape: f32[8,128], index: 9, kind: input, shape index: {}]   ;;  %s2924_s10 = inlined_call_operand.vmem [shape: f32[16,128], index: 10, kind: output, shape index: {}]  }
   0x1 LB: > { %s2462_s14 = sadd.s32 4294967295, %s2395_s13   ;;  %p1960_p0 = scmp.ge.s32.totalorder %s2395_s13, 1  ;;  %s2395_s13 = sphi %s2456_s13, %s20_s13  }
   0x2   : > { %p313_p1 = scmp.lt.s32.totalorder %s2395_s13, 3 }
   0x4   : > { %p314_p2 = pnand %p1960_p0, %p313_p1 }
   0x5   : > { %s1961_s17 = sshll.u32 (!%p314_p2), %s2462_s14, 2  ;;  %p356_p4 = scmp.lt.s32.totalorder (!%p314_p2), %s2462_s14, 1 }
   0x6   : > { %317 = sbr.rel (%p314_p2) target bundleno = 2661 (0xa65), region = 60  ;;  %p351_p3 = scmp.lt.s32.totalorder (!%p314_p2), %s1961_s17, 7 }
   0xb   : > { %v2242_v0 = vld [vmem:[%s2916_s2 + $0x38] sm:$0xff]   ;;  %v2243_v1 = vld [vmem:[%s2916_s2 + $0x30] sm:$0xff]   ;;  %s2926_s17 = smov (!%p351_p3, %s1961_s17), 7  ;;  %v2244_v2 = vld [vmem:[%s2916_s2 + $0x28] sm:$0xff]   ;;  %v368_v10 = vlaneseq  ;;  %vm2399_vm0 = vmmov 0   ;;  %vm924_vm1 = vcmask 130048  }
   0xc   : > { %2126 = vmatprep.subr.bf16.mxu0 %v2242_v0  ;;  %s1962_s22 = sshll.u32 %s2926_s17, 2  ;;  %v2245_v3 = vld [vmem:[%s2916_s2 + $0x20] sm:$0xff]   ;;  %v2246_v5 = vld [vmem:[%s2916_s2 + $0x18] sm:$0xff]   ;;  %v2247_v6 = vld [vmem:[%s2916_s2 + $0x10] sm:$0xff]   ;;  %vm1685_vm2 = vcmask 1043456   ;;  %vm1798_vm3 = vcmask 1041409  }
   0xd   : > { %2127 = vmatpush3.bf16.msra.mxu0 %v2242_v0  ;;  %s354_s25 = scalar_lea.vmem %s2914_s0, %s1962_s22  ;;  %v2248_v7 = vld [vmem:[%s2916_s2 + $0x8] sm:$0xff]   ;;  %v2249_v8 = vld [vmem:[%s2916_s2] sm:$0xff]   ;;  %v2494_v11 = vshrl.u32 %v368_v10, 7  ;;  %v2257_v48 = vld [vmem:[%s2917_s3 + $0xb0] ss:$12 sps:$4 sm:$0xff]   ;;  %v2397_v0 = vmov 0  }
   0xe   : > { %2128 = vmatprep.subr.bf16.mxu0 %v2243_v1  ;;  %v2250_v4 = vld [vmem:[%s354_s25] sm:$0xff]   ;;  %v2251_v9 = vld [vmem:[%s354_s25 + $0x8] sm:$0xff]   ;;  %v2258_v49 = vld [vmem:[%s2917_s3 + $0x90] ss:$12 sps:$4 sm:$0xff]   ;;  %766 = vmatprep.mubr.bf16.mxu1 %v2397_v0  ;;  %vm1800_vm4 = vcmask 1042434   ;;  %vm1802_vm5 = vcmask 1043459  }
   0xf   : > { %2142 = vmatprep.mubr.bf16.mxu0 %v2250_v4  ;;  %v2497_v12 = vsub.s32 0, %v2494_v11  ;;  %v2502_v13 = vld [vmem:[%s2923_s9] sm:$0xff]  ;;  %v506_v22 = vld [vmem:[%s2915_s1 + $0x8] sm:$0xff]  ;;  %v2273_v60 = vld [vmem:[%s2917_s3 + $0x50] ss:$12 sps:$4 sm:$0xff]   ;;  %vm1804_vm6 = vcmask 1044484  }
  0x10   : > { %v505_v16 = vld [vmem:[%s2915_s1] sm:$0xff]  ;;  %v2252_v29 = vld [vmem:[%s2917_s3 + $0xac] ss:$12 sps:$4 sm:$0xff]   ;;  %v2254_v30 = vld [vmem:[%s2917_s3 + $0xa8] ss:$12 sps:$4 sm:$0xff]   ;;  %vm1806_vm7 = vcmask 1045509  }
  0x11   : > { %2129 = vmatpush3.bf16.msra.mxu0 %v2243_v1  ;;  %v395_v14 = vrot.slane %v2502_v13, %v2497_v12  ;;  %734 = vmatprep.subr.bf16.mxu1 %v2252_v29  ;;  %v2255_v47 = vld [vmem:[%s2917_s3 + $0x94] ss:$12 sps:$4 sm:$0xff]   ;;  %v2259_v50 = vld [vmem:[%s2917_s3 + $0x7c] ss:$12 sps:$4 sm:$0xff]   ;;  %v2261_v51 = vld [vmem:[%s2917_s3 + $0x98] ss:$12 sps:$4 sm:$0xff]  }
  0x12   : > { %2130 = vmatprep.subr.bf16.mxu0 %v2244_v2  ;;  %735 = vmatpush1.bf16.msra.mxu1 %v2254_v30  ;;  %v2262_v52 = vld [vmem:[%s2917_s3 + $0x78] ss:$12 sps:$4 sm:$0xff]   ;;  %v2265_v54 = vld [vmem:[%s2917_s3 + $0x80] ss:$12 sps:$4 sm:$0xff]   ;;  %v2269_v57 = vld [vmem:[%s2917_s3 + $0x68] ss:$12 sps:$4 sm:$0xff]  }
  0x13   : > { %736 = vmatprep.subr.bf16.mxu1 %v2255_v47  ;;  %v2263_v53 = vld [vmem:[%s2917_s3 + $0x64] ss:$12 sps:$4 sm:$0xff]   ;;  %v2266_v55 = vld [vmem:[%s2917_s3 + $0x60] ss:$12 sps:$4 sm:$0xff]   ;;  %v2270_v58 = vld [vmem:[%s2917_s3 + $0x48] ss:$12 sps:$4 sm:$0xff]  }
  0x14   : > { %v2267_v56 = vld [vmem:[%s2917_s3 + $0x4c] ss:$12 sps:$4 sm:$0xff]   ;;  %v2271_v59 = vld [vmem:[%s2917_s3 + $0x34] ss:$12 sps:$4 sm:$0xff]   ;;  %v2274_v61 = vld [vmem:[%s2917_s3 + $0x30] ss:$12 sps:$4 sm:$0xff]  }
  0x15   : > { %2131 = vmatpush3.bf16.msra.mxu0 %v2244_v2  ;;  %v2275_v62 = vld [vmem:[%s2917_s3 + $0x1c] ss:$12 sps:$4 sm:$0xff]   ;;  %v2277_v63 = vld [vmem:[%s2917_s3 + $0x38] ss:$12 sps:$4 sm:$0xff]   ;;  %v2282_v4 = vld [vmem:[%s2917_s3] ss:$12 sps:$4 sm:$0xff]  }
  0x16   : > { %2132 = vmatprep.subr.bf16.mxu0 %v2245_v3  ;;  %737 = vmatpush1.bf16.msra.mxu1 %v2258_v49  ;;  %v2278_v1 = vld [vmem:[%s2917_s3 + $0x18] ss:$12 sps:$4 sm:$0xff]   ;;  %v566_v29 = vsub.s32 2, %v2494_v11  ;;  %v2398_v49 = vmov 0.0   ;;  %vm1808_vm8 = vcmask 1046534   ;;  %vm1810_vm9 = vcmask 1047559  }
  0x17   : > { %738 = vmatprep.subr.bf16.mxu1 %v2259_v50  ;;  %v2279_v2 = vld [vmem:[%s2917_s3 + $0x4] ss:$12 sps:$4 sm:$0xff]   ;;  %s2928_s14 = smov (!%p356_p4, %s2462_s14), 1 }
  0x18   : > { %s1963_s26 = sshll.u32 %s2928_s14, 3 }
  0x19   : > { %2133 = vmatpush3.bf16.msra.mxu0 %v2245_v3  ;;  %v2281_v3 = vld [vmem:[%s2917_s3 + $0x20] ss:$12 sps:$4 sm:$0xff]   ;;  %s359_s11 = scalar_lea.vmem %s2924_s10, %s1963_s26 }
  0x1a   : > { %2134 = vmatprep.subr.bf16.mxu0 %v2246_v5  ;;  %739 = vmatpush1.bf16.msra.mxu1 %v2262_v52 }
  0x1b   : > { %740 = vmatprep.subr.bf16.mxu1 %v2263_v53 }
  0x1d   : > { %2135 = vmatpush3.bf16.msra.mxu0 %v2246_v5  ;;  %v2283_v5 = vld [vmem:[%s2917_s3 + $0x8] ss:$12 sps:$4 sm:$0xff]  }
  0x1e   : > { %2136 = vmatprep.subr.bf16.mxu0 %v2247_v6  ;;  %741 = vmatpush1.bf16.msra.mxu1 %v2266_v55 }
  0x1f   : > { %742 = vmatprep.subr.bf16.mxu1 %v2267_v56 }
  0x21   : > { %2137 = vmatpush3.bf16.msra.mxu0 %v2247_v6 }
  0x22   : > { %2138 = vmatprep.subr.bf16.mxu0 %v2248_v7  ;;  %743 = vmatpush1.bf16.msra.mxu1 %v2270_v58 }
  0x23   : > { %744 = vmatprep.subr.bf16.mxu1 %v2271_v59 }
  0x25   : > { %2139 = vmatpush3.bf16.msra.mxu0 %v2248_v7 }
  0x26   : > { %2140 = vmatprep.subr.bf16.mxu0 %v2249_v8  ;;  %745 = vmatpush1.bf16.msra.mxu1 %v2274_v61 }
  0x27   : > { %746 = vmatprep.subr.bf16.mxu1 %v2275_v62 }
  0x29   : > { %2141 = vmatpush3.bf16.msra.mxu0 %v2249_v8 }
  0x2a   : > { %2146 = vmatprep.subr.bf16.mxu0 %v2257_v48  ;;  %747 = vmatpush1.bf16.msra.mxu1 %v2278_v1 }
  0x2b   : > { %748 = vmatprep.subr.bf16.mxu1 %v2279_v2 }
  0x2c   : > { %2143 = vmatmul.mubr.bf16.vlgmr.msra.gmra.mxu0 %v2251_v9 }
  0x2d   : > { %2147 = vmatpush3.bf16.msra.mxu0 %v2257_v48 }
  0x2e   : > { %2148 = vmatprep.subr.bf16.mxu0 %v2261_v51  ;;  %749 = vmatpush1.bf16.msra.mxu1 %v2282_v4 }
  0x2f   : > { %2166 = vmatprep.subr.bf16.mxu1 %v2398_v49 }
  0x31   : > { %2149 = vmatpush3.bf16.msra.mxu0 %v2261_v51 }
  0x32   : > { %2150 = vmatprep.subr.bf16.mxu0 %v2265_v54 }
  0x35   : > { %2151 = vmatpush3.bf16.msra.mxu0 %v2265_v54 }
  0x36   : > { %2152 = vmatprep.subr.bf16.mxu0 %v2269_v57 }
  0x39   : > { %2153 = vmatpush3.bf16.msra.mxu0 %v2269_v57 }
  0x3a   : > { %2154 = vmatprep.subr.bf16.mxu0 %v2273_v60 }
  0x3d   : > { %2155 = vmatpush3.bf16.msra.mxu0 %v2273_v60 }
  0x3e   : > { %2156 = vmatprep.subr.bf16.mxu0 %v2277_v63 }
  0x41   : > { %2157 = vmatpush3.bf16.msra.mxu0 %v2277_v63 }
  0x42   : > { %2158 = vmatprep.subr.bf16.mxu0 %v2281_v3 }
  0x45   : > { %2159 = vmatpush3.bf16.msra.mxu0 %v2281_v3 }
  0x46   : > { %2160 = vmatprep.subr.bf16.mxu0 %v2283_v5 }
  0x49   : > { %2161 = vmatpush3.bf16.msra.mxu0 %v2283_v5 }
  0x4a   : > { %2184 = vmatprep.subr.bf16.mxu0 %v2398_v49 }
  0xec   : > { %v2144_v15 = vpop.f32.mrf.mxu0 }
  0xed   : > { %v499_v17 = vadd.f32 %v2144_v15, %v395_v14 }
  0xee   : > { %v490_v18 = vpop.f32.mrf.mxu0 }
  0xef   : > { %v2509_v19 = vadd.f32 %v505_v16, %v499_v17  ;;  %v491_v20 = vadd.f32 %v490_v18, %v395_v14 }
  0xf0   : > { %v2145_v21 = vpop.f32.mrf.mxu0 }
  0xf1   : > { %v2514_v23 = vadd.f32 %v505_v16, %v491_v20  ;;  %v502_v24 = vadd.f32 %v2145_v21, %v395_v14  ;;  %515 = vadd.xlane.f32.xlu1 %v2509_v19 }
  0xf2   : > { %v493_v25 = vpop.f32.mrf.mxu0 }
  0xf3   : > { %v2517_v26 = vadd.f32 %v506_v22, %v502_v24  ;;  %v494_v27 = vadd.f32 %v493_v25, %v395_v14  ;;  %511 = vadd.xlane.f32.xlu0 %v2514_v23 }
  0xf5   : > { %v2520_v28 = vadd.f32 %v506_v22, %v494_v27  ;;  %517 = vadd.xlane.f32.xlu1 %v2517_v26  ;;  %v558_v22 = vsub.s32 1, %v2494_v11 }
  0xf7   : > { %513 = vadd.xlane.f32.xlu0 %v2520_v28  ;;  %v559_v27 = vrot.slane %v2502_v13, %v558_v22 }
 0x17a   : > { %v516_v31 = vpop.xlane.xlu1 %515 }
 0x17b   : > { %v522_v33 = vmul.f32 0.0078125, %v516_v31 }
 0x17c   : > { %v512_v32 = vpop.xlane.xlu0 %511 }
 0x17d   : > { %v520_v34 = vmul.f32 0.0078125, %v512_v32  ;;  %v2534_v38 = vsub.f32 %v2509_v19, %v522_v33 }
 0x17e   : > { %v518_v35 = vpop.xlane.xlu1 %517 }
 0x17f   : > { %v2531_v36 = vsub.f32 %v2514_v23, %v520_v34  ;;  %v523_v39 = vmul.f32 0.0078125, %v518_v35  ;;  %v530_v44 = vmul.f32 %v2534_v38, %v2534_v38  ;;  %v567_v34 = vrot.slane %v2502_v13, %v566_v29 }
 0x180   : > { %v514_v37 = vpop.xlane.xlu0 %513 }
 0x181   : > { %v521_v40 = vmul.f32 0.0078125, %v514_v37  ;;  %v528_v41 = vmul.f32 %v2531_v36, %v2531_v36  ;;  %v2542_v43 = vsub.f32 %v2517_v26, %v523_v39 }
 0x183   : > { %v2539_v42 = vsub.f32 %v2520_v28, %v521_v40  ;;  %532 = vadd.xlane.f32.xlu0 %v528_v41  ;;  %v531_v46 = vmul.f32 %v2542_v43, %v2542_v43 }
 0x185   : > { %v529_v45 = vmul.f32 %v2539_v42, %v2539_v42 }
 0x187   : > { %536 = vadd.xlane.f32.xlu0 %v530_v44  ;;  %534 = vadd.xlane.f32.xlu1 %v529_v45 }
 0x18b   : > { %538 = vadd.xlane.f32.xlu1 %v531_v46 }
 0x20c   : > { %v533_v6 = vpop.xlane.xlu0 %532 }
 0x20d   : > { %v540_v7 = vmul.f32 0.0078125, %v533_v6 }
 0x20f   : > { %v544_v8 = vadd.f32 1e-05, %v540_v7 }
 0x210   : > { %v535_v9 = vpop.xlane.xlu1 %534  ;;  %v537_v10 = vpop.xlane.xlu0 %536 }
 0x211   : > { %2340 = vrsqrt.f32 %v544_v8  ;;  %v541_v14 = vmul.f32 0.0078125, %v535_v9  ;;  %v542_v15 = vmul.f32 0.0078125, %v537_v10 }
 0x213   : > { %v545_v16 = vadd.f32 1e-05, %v541_v14  ;;  %v546_v17 = vadd.f32 1e-05, %v542_v15 }
 0x214   : > { %v539_v18 = vpop.xlane.xlu1 %538 }
 0x215   : > { %2342 = vrsqrt.f32 %v545_v16  ;;  %v543_v20 = vmul.f32 0.0078125, %v539_v18 }
 0x216   : > { %2344 = vrsqrt.f32 %v546_v17 }
 0x217   : > { %v547_v21 = vadd.f32 1e-05, %v543_v20 }
 0x219   : > { %2346 = vrsqrt.f32 %v547_v21 }
 0x21e   : > { %v2341_v24 = vpop.eup %2340 }
 0x21f   : > { %v552_v25 = vmul.f32 %v2341_v24, %v2531_v36 }
 0x221   : > { %v560_v33 = vmul.f32 %v559_v27, %v552_v25 }
 0x222   : > { %v2343_v30 = vpop.eup %2342 }
 0x223   : > { %v2345_v31 = vpop.eup %2344  ;;  %v553_v32 = vmul.f32 %v2343_v30, %v2539_v42  ;;  %v568_v40 = vadd.f32 %v567_v34, %v560_v33 }
 0x224   : > { %v554_v35 = vmul.f32 %v2345_v31, %v2534_v38 }
 0x225   : > { %v561_v37 = vmul.f32 %v559_v27, %v553_v32 }
 0x226   : > { %v2347_v39 = vpop.eup %2346  ;;  %v562_v36 = vmul.f32 %v559_v27, %v554_v35 }
 0x227   : > { %v569_v41 = vadd.f32 %v567_v34, %v561_v37  ;;  %v555_v44 = vmul.f32 %v2347_v39, %v2542_v43 }
 0x228   : > { %v570_v47 = vadd.f32 %v567_v34, %v562_v36 }
 0x229   : > { %v572_v45 = vpack.c.bf16 %v569_v41, %v568_v40  ;;  %v563_v46 = vmul.f32 %v559_v27, %v555_v44 }
 0x22b   : > { %767 = vmatmul.mubr.bf16.vlgmr.msra.gmra.mxu1 %v572_v45  ;;  %2162 = vmatprep.mubr.bf16.mxu0 %v572_v45  ;;  %v571_v48 = vadd.f32 %v567_v34, %v563_v46  ;;  %v2284_v45 = vld [vmem:[%s2918_s4 + $0x38] sm:$0xff]  }
 0x22c   : > { %776 = vmatprep.mubr.bf16.mxu1 %v2397_v0 }
 0x22d   : > { %v573_v42 = vpack.c.bf16 %v571_v48, %v570_v47 }
 0x22f   : > { %2163 = vmatmul.mubr.bf16.vlgmr.msra.gmra.mxu0 %v573_v42 }
 0x230   : > { %2186 = vmatprep.mubr.msk.bf16.mxu0 %vm2399_vm0, %v2398_v49 }
 0x233   : > { %777 = vmatmul.mubr.bf16.gmra.mxu1 %v573_v42 }
 0x234   : > { %2168 = vmatprep.mubr.msk.bf16.mxu1 %vm2399_vm0, %v2398_v49 }
 0x2eb   : > { %v768_v38 = vpop.f32.mrf.mxu1 }
 0x2ed   : > { %v770_v43 = vpop.f32.mrf.mxu1 }
 0x2ef   : > { %v772_v50 = vpop.f32.mrf.mxu1  ;;  %v2164_v51 = vpop.f32.mrf.mxu0 }
 0x2f0   : > { %v836_v60 = vpack.c.bf16 %v772_v50, %v768_v38 }
 0x2f1   : > { %v774_v52 = vpop.f32.mrf.mxu1  ;;  %v821_v53 = vpop.f32.mrf.mxu0 }
 0x2f2   : > { %v837_v54 = vpack.c.bf16 %v774_v52, %v770_v43 }
 0x2f3   : > { %v778_v55 = vpop.f32.mrf.mxu1  ;;  %v2165_v56 = vpop.f32.mrf.mxu0 }
 0x2f4   : > { %v841_v57 = vpack.c.bf16 %v2165_v56, %v2164_v51  ;;  %2167 = vmatpush3.bf16.xpose.msra.mxu1 %v837_v54 }
 0x2f5   : > { %v780_v58 = vpop.f32.mrf.mxu1  ;;  %2172 = vmatprep.subr.bf16.mxu1 %v2398_v49  ;;  %v824_v63 = vpop.f32.mrf.mxu0 }
 0x2f6   : > { %2185 = vmatpush3.bf16.msra.mxu0 %v841_v57  ;;  %v838_v2 = vpack.c.bf16 %v824_v63, %v821_v53  ;;  %v2285_v53 = vld [vmem:[%s2918_s4 + $0x30] sm:$0xff]   ;;  %v2290_v63 = vld [vmem:[%s2918_s4 + $0x8] sm:$0xff]  }
 0x2f7   : > { %v782_v59 = vpop.f32.mrf.mxu1 }
 0x2f8   : > { %v839_v1 = vpack.c.bf16 %v782_v59, %v778_v55  ;;  %v2286_v55 = vld [vmem:[%s2918_s4 + $0x28] sm:$0xff]  }
 0x2f9   : > { %v784_v61 = vpop.f32.mrf.mxu1 }
 0x2fa   : > { %v840_v62 = vpack.c.bf16 %v784_v61, %v780_v58  ;;  %v2288_v61 = vld [vmem:[%s2918_s4 + $0x18] sm:$0xff]  }
 0x2fb   : > { %2169 = vmatmul.mubr.bf16.vlgmr.msra.gmra.mxu1 %v836_v60  ;;  %v2287_v60 = vld [vmem:[%s2918_s4 + $0x20] sm:$0xff]  }
 0x2fc   : > { %2173 = vmatpush3.bf16.xpose.msra.mxu1 %v840_v62  ;;  %2174 = vmatprep.mubr.msk.bf16.mxu1 %vm2399_vm0, %v2398_v49  ;;  %v2289_v62 = vld [vmem:[%s2918_s4 + $0x10] sm:$0xff]  }
 0x2fd   : > { %2178 = vmatprep.subr.bf16.mxu1 %v2398_v49 }
 0x303   : > { %2175 = vmatmul.mubr.bf16.vlgmr.msra.gmra.mxu1 %v839_v1  ;;  %v2291_v1 = vld [vmem:[%s2918_s4] sm:$0xff]  }
 0x304   : > { %2179 = vmatpush3.bf16.msra.mxu1 %v838_v2  ;;  %2180 = vmatprep.mubr.msk.bf16.mxu1 %vm2399_vm0, %v2398_v49 }
 0x305   : > { %2190 = vmatprep.subr.bf16.mxu1 %v2284_v45 }
 0x3bb   : > { %v876_v3 = vpop.f32.mrf.mxu1 }
 0x3bc   : > { %v925_v4 = vsel %vm924_vm1, %v876_v3, -inf }
 0x3bd   : > { %926 = vmax.xlane.f32.xlu0 %v925_v4  ;;  %v2170_v5 = vpop.f32.mrf.mxu1 }
 0x3bf   : > { %v879_v6 = vpop.f32.mrf.mxu1 }
 0x3c0   : > { %v928_v7 = vsel %vm924_vm1, %v879_v6, -inf }
 0x3c1   : > { %929 = vmax.xlane.f32.xlu1 %v928_v7  ;;  %v2171_v8 = vpop.f32.mrf.mxu1 }
 0x3c3   : > { %v917_v9 = vpop.f32.mrf.mxu1 }
 0x3c4   : > { %v931_v10 = vsel %vm924_vm1, %v917_v9, -inf }
 0x3c5   : > { %932 = vmax.xlane.f32.xlu0 %v931_v10  ;;  %v2176_v14 = vpop.f32.mrf.mxu1 }
 0x3c7   : > { %v920_v15 = vpop.f32.mrf.mxu1 }
 0x3c8   : > { %v934_v16 = vsel %vm924_vm1, %v920_v15, -inf }
 0x3c9   : > { %935 = vmax.xlane.f32.xlu1 %v934_v16  ;;  %v2177_v17 = vpop.f32.mrf.mxu1 }
 0x446   : > { %v927_v18 = vpop.xlane.xlu0 %926 }
 0x447   : > { %v937_v20 = vsub.f32 %v876_v3, %v927_v18 }
 0x449   : > { %v941_v21 = vmul.f32 1.442695, %v937_v20 }
 0x44a   : > { %v930_v22 = vpop.xlane.xlu1 %929 }
 0x44b   : > { %2348 = vpow2.f32 %v941_v21  ;;  %v938_v24 = vsub.f32 %v879_v6, %v930_v22 }
 0x44d   : > { %v943_v25 = vmul.f32 1.442695, %v938_v24 }
 0x44e   : > { %v933_v27 = vpop.xlane.xlu0 %932 }
 0x44f   : > { %2350 = vpow2.f32 %v943_v25  ;;  %v939_v29 = vsub.f32 %v917_v9, %v933_v27 }
 0x451   : > { %v945_v30 = vmul.f32 1.442695, %v939_v29 }
 0x452   : > { %v936_v31 = vpop.xlane.xlu1 %935 }
 0x453   : > { %2352 = vpow2.f32 %v945_v30  ;;  %v940_v32 = vsub.f32 %v920_v15, %v936_v31 }
 0x455   : > { %v947_v33 = vmul.f32 1.442695, %v940_v32 }
 0x457   : > { %2354 = vpow2.f32 %v947_v33 }
 0x458   : > { %v2349_v34 = vpop.eup %2348 }
 0x459   : > { %v949_v35 = vsel %vm924_vm1, %v2349_v34, 0.0 }
 0x45a   : > { %950 = vadd.xlane.f32.xlu0 %v949_v35 }
 0x45c   : > { %v2351_v37 = vpop.eup %2350 }
 0x45d   : > { %v952_v39 = vsel %vm924_vm1, %v2351_v37, 0.0 }
 0x45e   : > { %953 = vadd.xlane.f32.xlu1 %v952_v39 }
 0x460   : > { %v2353_v40 = vpop.eup %2352 }
 0x461   : > { %v955_v41 = vsel %vm924_vm1, %v2353_v40, 0.0 }
 0x462   : > { %956 = vadd.xlane.f32.xlu0 %v955_v41 }
 0x464   : > { %v2355_v44 = vpop.eup %2354 }
 0x465   : > { %v958_v36 = vsel %vm924_vm1, %v2355_v44, 0.0 }
 0x466   : > { %959 = vadd.xlane.f32.xlu1 %v958_v36  ;;  %v2297_v36 = vld [vmem:[%s2919_s5 + $0x64] ss:$8 sps:$4 sm:$0xff]  }
 0x4e3   : > { %v951_v46 = vpop.xlane.xlu0 %950 }
 0x4e4   : > { %2356 = vrcp.f32 %v951_v46  ;;  %v2300_v46 = vld [vmem:[%s2919_s5 + $0x54] ss:$8 sps:$4 sm:$0xff]  }
 0x4e7   : > { %v954_v47 = vpop.xlane.xlu1 %953 }
 0x4e8   : > { %2358 = vrcp.f32 %v954_v47  ;;  %v2298_v47 = vld [vmem:[%s2919_s5 + $0x50] ss:$8 sps:$4 sm:$0xff]  }
 0x4eb   : > { %v957_v48 = vpop.xlane.xlu0 %956 }
 0x4ec   : > { %2360 = vrcp.f32 %v957_v48  ;;  %v2303_v48 = vld [vmem:[%s2919_s5 + $0x44] ss:$8 sps:$4 sm:$0xff]  }
 0x4ef   : > { %v960_v42 = vpop.xlane.xlu1 %959 }
 0x4f0   : > { %2362 = vrcp.f32 %v960_v42  ;;  %v2301_v42 = vld [vmem:[%s2919_s5 + $0x40] ss:$8 sps:$4 sm:$0xff]  }
 0x4f1   : > { %v2357_v38 = vpop.eup %2356 }
 0x4f2   : > { %v965_v50 = vmul.f32 %v2357_v38, %v2349_v34  ;;  %v2304_v38 = vld [vmem:[%s2919_s5 + $0x30] ss:$8 sps:$4 sm:$0xff]  }
 0x4f5   : > { %v2359_v43 = vpop.eup %2358 }
 0x4f6   : > { %v966_v51 = vmul.f32 %v2359_v43, %v2351_v37  ;;  %v2306_v43 = vld [vmem:[%s2919_s5 + $0x34] ss:$8 sps:$4 sm:$0xff]  }
 0x4f8   : > { %v969_v52 = vpack.c.bf16 %v966_v51, %v965_v50  ;;  %v2309_v50 = vld [vmem:[%s2919_s5 + $0x24] ss:$8 sps:$4 sm:$0xff]   ;;  %v2307_v51 = vld [vmem:[%s2919_s5 + $0x20] ss:$8 sps:$4 sm:$0xff]  }
 0x4f9   : > { %v2361_v54 = vpop.eup %2360 }
 0x4fa   : > { %2181 = vmatmul.mubr.msk.bf16.vlgmr.msra.gmra.mxu1 %vm924_vm1, %v969_v52  ;;  %v967_v57 = vmul.f32 %v2361_v54, %v2353_v40  ;;  %v2312_v52 = vld [vmem:[%s2919_s5 + $0x14] ss:$8 sps:$4 sm:$0xff]   ;;  %v2315_v54 = vld [vmem:[%s2919_s5 + $0x4] ss:$8 sps:$4 sm:$0xff]  }
 0x4fb   : > { %2191 = vmatpush3.bf16.msra.mxu1 %v2284_v45  ;;  %v2295_v45 = vld [vmem:[%s2919_s5 + $0x60] ss:$8 sps:$4 sm:$0xff]  }
 0x4fc   : > { %2192 = vmatprep.subr.bf16.mxu1 %v2285_v53 }
 0x4fd   : > { %v2363_v56 = vpop.eup %2362 }
 0x4fe   : > { %v968_v58 = vmul.f32 %v2363_v56, %v2355_v44 }
 0x4ff   : > { %2193 = vmatpush3.bf16.msra.mxu1 %v2285_v53  ;;  %v2310_v53 = vld [vmem:[%s2919_s5 + $0x10] ss:$8 sps:$4 sm:$0xff]  }
 0x500   : > { %v970_v59 = vpack.c.bf16 %v968_v58, %v967_v57  ;;  %2194 = vmatprep.subr.bf16.mxu1 %v2286_v55 }
 0x502   : > { %2187 = vmatmul.mubr.msk.bf16.vlgmr.msra.gmra.mxu0 %vm924_vm1, %v970_v59 }
 0x503   : > { %2195 = vmatpush3.bf16.msra.mxu1 %v2286_v55  ;;  %1387 = vmatprep.mubr.bf16.mxu0 %v2397_v0  ;;  %v2313_v55 = vld [vmem:[%s2919_s5] ss:$8 sps:$4 sm:$0xff]  }
 0x504   : > { %2196 = vmatprep.subr.bf16.mxu1 %v2287_v60 }
 0x507   : > { %2197 = vmatpush3.bf16.msra.mxu1 %v2287_v60 }
 0x508   : > { %2198 = vmatprep.subr.bf16.mxu1 %v2288_v61 }
 0x50b   : > { %2199 = vmatpush3.bf16.msra.mxu1 %v2288_v61 }
 0x50c   : > { %2200 = vmatprep.subr.bf16.mxu1 %v2289_v62 }
 0x50f   : > { %2201 = vmatpush3.bf16.msra.mxu1 %v2289_v62 }
 0x510   : > { %2202 = vmatprep.subr.bf16.mxu1 %v2290_v63 }
 0x513   : > { %2203 = vmatpush3.bf16.msra.mxu1 %v2290_v63 }
 0x514   : > { %2204 = vmatprep.subr.bf16.mxu1 %v2291_v1 }
 0x517   : > { %2205 = vmatpush3.bf16.msra.mxu1 %v2291_v1 }
 0x5ba   : > { %v1008_v2 = vpop.f32.mrf.mxu1 }
 0x5bc   : > { %v2182_v3 = vpop.f32.mrf.mxu1 }
 0x5be   : > { %v1011_v4 = vpop.f32.mrf.mxu1 }
 0x5bf   : > { %v1059_v5 = vpack.c.bf16 %v1011_v4, %v1008_v2 }
 0x5c0   : > { %v2183_v6 = vpop.f32.mrf.mxu1 }
 0x5c1   : > { %2206 = vmatprep.mubr.bf16.mxu1 %v1059_v5  ;;  %v1224_v5 = vsub.s32 3, %v2494_v11 }
 0x5c2   : > { %v1052_v7 = vpop.f32.mrf.mxu0 }
 0x5c4   : > { %v2188_v8 = vpop.f32.mrf.mxu0 }
 0x5c5   : > { %v1225_v8 = vrot.slane %v2502_v13, %v1224_v5 }
 0x5c6   : > { %v1055_v9 = vpop.f32.mrf.mxu0 }
 0x5c7   : > { %v1060_v10 = vpack.c.bf16 %v1055_v9, %v1052_v7  ;;  %v1232_v9 = vsub.s32 4, %v2494_v11 }
 0x5c8   : > { %v2189_v14 = vpop.f32.mrf.mxu0 }
 0x5c9   : > { %2207 = vmatmul.mubr.bf16.vlgmr.msra.gmra.mxu1 %v1060_v10 }
 0x689   : > { %v2208_v15 = vpop.f32.mrf.mxu1 }
 0x68a   : > { %v2678_v21 = vadd.f32 %v2208_v15, %v2509_v19  ;;  %v2294_v19 = vld [vmem:[%s2919_s5 + $0x74] ss:$8 sps:$4 sm:$0xff]  }
 0x68b   : > { %v1159_v16 = vpop.f32.mrf.mxu1  ;;  %1355 = vmatprep.subr.bf16.mxu0 %v2294_v19 }
 0x68c   : > { %v2674_v17 = vadd.f32 %v1159_v16, %v2514_v23  ;;  %v2292_v23 = vld [vmem:[%s2919_s5 + $0x70] ss:$8 sps:$4 sm:$0xff]   ;;  %v1233_v16 = vrot.slane %v2502_v13, %v1232_v9 }
 0x68d   : > { %v2209_v18 = vpop.f32.mrf.mxu1  ;;  %1356 = vmatpush1.bf16.msra.mxu0 %v2292_v23 }
 0x68e   : > { %1178 = vadd.xlane.f32.xlu0 %v2674_v17  ;;  %v2686_v24 = vadd.f32 %v2209_v18, %v2517_v26  ;;  %1357 = vmatprep.subr.bf16.mxu0 %v2297_v36  ;;  %v2324_v36 = vld [vmem:[%s2920_s6 + $0x58] sm:$0xff]  }
 0x68f   : > { %v1162_v20 = vpop.f32.mrf.mxu1 }
 0x690   : > { %v2681_v22 = vadd.f32 %v1162_v20, %v2520_v28 }
 0x691   : > { %1358 = vmatpush1.bf16.msra.mxu0 %v2295_v45  ;;  %v2325_v45 = vld [vmem:[%s2920_s6 + $0x18] sm:$0xff]  }
 0x692   : > { %1182 = vadd.xlane.f32.xlu0 %v2678_v21  ;;  %1180 = vadd.xlane.f32.xlu1 %v2681_v22 }
 0x693   : > { %1359 = vmatprep.subr.bf16.mxu0 %v2300_v46  ;;  %v2326_v46 = vld [vmem:[%s2920_s6 + $0x50] sm:$0xff]  }
 0x695   : > { %1360 = vmatpush1.bf16.msra.mxu0 %v2298_v47  ;;  %v2327_v47 = vld [vmem:[%s2920_s6 + $0x10] sm:$0xff]  }
 0x696   : > { %1184 = vadd.xlane.f32.xlu1 %v2686_v24  ;;  %1361 = vmatprep.subr.bf16.mxu0 %v2303_v48  ;;  %v2328_v48 = vld [vmem:[%s2920_s6 + $0x48] sm:$0xff]  }
 0x699   : > { %1362 = vmatpush1.bf16.msra.mxu0 %v2301_v42  ;;  %v2329_v42 = vld [vmem:[%s2920_s6 + $0x8] sm:$0xff]  }
 0x69a   : > { %1363 = vmatprep.subr.bf16.mxu0 %v2306_v43  ;;  %v2331_v43 = vld [vmem:[%s2920_s6] sm:$0xff]  }
 0x69d   : > { %1364 = vmatpush1.bf16.msra.mxu0 %v2304_v38  ;;  %v2330_v38 = vld [vmem:[%s2920_s6 + $0x40] sm:$0xff]  }
 0x69e   : > { %1365 = vmatprep.subr.bf16.mxu0 %v2309_v50  ;;  %v2400_v50 = vmov 1966171168  }
 0x6a1   : > { %1366 = vmatpush1.bf16.msra.mxu0 %v2307_v51  ;;  %v366_v51 = vunpack.c.l.s4 %v2400_v50 }
 0x6a2   : > { %1367 = vmatprep.subr.bf16.mxu0 %v2312_v52 }
 0x6a3   : > { %v367_v52 = vunpack.c.0.s8 %v366_v51 }
 0x6a5   : > { %1368 = vmatpush1.bf16.msra.mxu0 %v2310_v53  ;;  %v363_v53 = vrot.slane %v2502_v13, 6 }
 0x6a6   : > { %1369 = vmatprep.subr.bf16.mxu0 %v2315_v54  ;;  %v370_v54 = vsub.s32 %v367_v52, %v2494_v11 }
 0x6a9   : > { %1370 = vmatpush1.bf16.msra.mxu0 %v2313_v55  ;;  %v371_v55 = vrot.slane %v363_v53, %v370_v54 }
 0x6aa   : > { %2210 = vmatprep.subr.bf16.mxu0 %v2398_v49 }
 0x717   : > { %v1179_v28 = vpop.xlane.xlu0 %1178 }
 0x718   : > { %v1186_v25 = vmul.f32 0.0078125, %v1179_v28 }
 0x71a   : > { %v2696_v27 = vsub.f32 %v2674_v17, %v1186_v25 }
 0x71b   : > { %v1183_v29 = vpop.xlane.xlu0 %1182  ;;  %v1181_v26 = vpop.xlane.xlu1 %1180 }
 0x71c   : > { %v1188_v30 = vmul.f32 0.0078125, %v1183_v29  ;;  %v1187_v31 = vmul.f32 0.0078125, %v1181_v26  ;;  %v1194_v32 = vmul.f32 %v2696_v27, %v2696_v27 }
 0x71e   : > { %v2701_v33 = vsub.f32 %v2678_v21, %v1188_v30  ;;  %v1191_v34 = vsub.f32 %v2681_v22, %v1187_v31  ;;  %1198 = vadd.xlane.f32.xlu0 %v1194_v32 }
 0x71f   : > { %v1185_v35 = vpop.xlane.xlu1 %1184 }
 0x720   : > { %v1189_v37 = vmul.f32 0.0078125, %v1185_v35  ;;  %v1196_v39 = vmul.f32 %v2701_v33, %v2701_v33  ;;  %v1195_v40 = vmul.f32 %v1191_v34, %v1191_v34  ;;  %v2316_v35 = vld [vmem:[%s2920_s6 + $0x78] sm:$0xff]  }
 0x721   : > { %2089 = vmatprep.subr.bf16.mxu1 %v2316_v35 }
 0x722   : > { %v1193_v41 = vsub.f32 %v2686_v24, %v1189_v37  ;;  %1202 = vadd.xlane.f32.xlu0 %v1196_v39  ;;  %1200 = vadd.xlane.f32.xlu1 %v1195_v40  ;;  %v2319_v37 = vld [vmem:[%s2920_s6 + $0x30] sm:$0xff]   ;;  %v2320_v39 = vld [vmem:[%s2920_s6 + $0x68] sm:$0xff]  }
 0x723   : > { %v2321_v40 = vld [vmem:[%s2920_s6 + $0x28] sm:$0xff]  }
 0x724   : > { %v1197_v44 = vmul.f32 %v1193_v41, %v1193_v41 }
 0x726   : > { %1204 = vadd.xlane.f32.xlu1 %v1197_v44  ;;  %v2323_v44 = vld [vmem:[%s2920_s6 + $0x20] sm:$0xff]  }
 0x7a7   : > { %v1199_v56 = vpop.xlane.xlu0 %1198 }
 0x7a8   : > { %v1206_v57 = vmul.f32 0.0078125, %v1199_v56  ;;  %v1260_v56 = vrot.slane %v371_v55, %v2497_v12 }
 0x7aa   : > { %v1210_v58 = vadd.f32 1e-05, %v1206_v57  ;;  %v1264_v57 = vrot.slane %v371_v55, %v1232_v9 }
 0x7ab   : > { %v1203_v59 = vpop.xlane.xlu0 %1202  ;;  %v1201_v60 = vpop.xlane.xlu1 %1200 }
 0x7ac   : > { %2364 = vrsqrt.f32 %v1210_v58  ;;  %v1208_v61 = vmul.f32 0.0078125, %v1203_v59  ;;  %v1207_v62 = vmul.f32 0.0078125, %v1201_v60  ;;  %v1270_v58 = vrot.slane %v1260_v56, %v2497_v12 }
 0x7ad   : > { %v1274_v59 = vrot.slane %v1264_v57, %v2497_v12 }
 0x7ae   : > { %v1211_v63 = vadd.f32 1e-05, %v1207_v62  ;;  %v1212_v1 = vadd.f32 1e-05, %v1208_v61 }
 0x7af   : > { %v1205_v2 = vpop.xlane.xlu1 %1204 }
 0x7b0   : > { %v1209_v3 = vmul.f32 0.0078125, %v1205_v2  ;;  %2366 = vrsqrt.f32 %v1211_v63 }
 0x7b1   : > { %2368 = vrsqrt.f32 %v1212_v1 }
 0x7b2   : > { %v1213_v4 = vadd.f32 1e-05, %v1209_v3 }
 0x7b4   : > { %2370 = vrsqrt.f32 %v1213_v4 }
 0x7b9   : > { %v2365_v6 = vpop.eup %2364 }
 0x7ba   : > { %v1218_v7 = vmul.f32 %v2365_v6, %v2696_v27 }
 0x7bc   : > { %v1226_v15 = vmul.f32 %v1225_v8, %v1218_v7 }
 0x7bd   : > { %v2367_v10 = vpop.eup %2366 }
 0x7be   : > { %v1219_v14 = vmul.f32 %v2367_v10, %v1191_v34  ;;  %v2369_v18 = vpop.eup %2368  ;;  %v1234_v28 = vadd.f32 %v1233_v16, %v1226_v15 }
 0x7bf   : > { %v1220_v29 = vmul.f32 %v2369_v18, %v2701_v33  ;;  %v2317_v33 = vld [vmem:[%s2920_s6 + $0x38] sm:$0xff]  }
 0x7c0   : > { %v1227_v23 = vmul.f32 %v1225_v8, %v1219_v14  ;;  %2090 = vmatpush3.bf16.msra.mxu1 %v2317_v33 }
 0x7c1   : > { %v2371_v20 = vpop.eup %2370  ;;  %v1228_v27 = vmul.f32 %v1225_v8, %v1220_v29 }
 0x7c2   : > { %v1221_v19 = vmul.f32 %v2371_v20, %v1193_v41  ;;  %v1235_v25 = vadd.f32 %v1233_v16, %v1227_v23  ;;  %v2322_v41 = vld [vmem:[%s2920_s6 + $0x60] sm:$0xff]  }
 0x7c3   : > { %v1236_v32 = vadd.f32 %v1233_v16, %v1228_v27 }
 0x7c4   : > { %v1238_v26 = vpack.c.bf16 %v1235_v25, %v1234_v28  ;;  %v1229_v30 = vmul.f32 %v1225_v8, %v1221_v19 }
 0x7c6   : > { %1388 = vmatmul.mubr.bf16.vlgmr.msra.gmra.mxu0 %v1238_v26  ;;  %v1237_v31 = vadd.f32 %v1233_v16, %v1229_v30 }
 0x7c7   : > { %1397 = vmatprep.mubr.bf16.mxu0 %v2397_v0  ;;  %v2318_v0 = vld [vmem:[%s2920_s6 + $0x70] sm:$0xff]  }
 0x7c8   : > { %v1239_v34 = vpack.c.bf16 %v1237_v31, %v1236_v32  ;;  %2091 = vmatprep.subr.bf16.mxu1 %v2318_v0 }
 0x7c9   : > { %2092 = vmatpush3.bf16.msra.mxu1 %v2319_v37 }
 0x7ca   : > { %2093 = vmatprep.subr.bf16.mxu1 %v2320_v39 }
 0x7cd   : > { %2094 = vmatpush3.bf16.msra.mxu1 %v2321_v40 }
 0x7ce   : > { %1398 = vmatmul.mubr.bf16.gmra.mxu0 %v1239_v34  ;;  %2095 = vmatprep.subr.bf16.mxu1 %v2322_v41 }
 0x7cf   : > { %2226 = vmatprep.mubr.msk.bf16.mxu0 %vm2399_vm0, %v2398_v49 }
 0x7d1   : > { %2096 = vmatpush3.bf16.msra.mxu1 %v2323_v44 }
 0x7d2   : > { %2097 = vmatprep.subr.bf16.mxu1 %v2324_v36 }
 0x7d5   : > { %2098 = vmatpush3.bf16.msra.mxu1 %v2325_v45 }
 0x7d6   : > { %2099 = vmatprep.subr.bf16.mxu1 %v2326_v46 }
 0x7d9   : > { %2100 = vmatpush3.bf16.msra.mxu1 %v2327_v47 }
 0x7da   : > { %2101 = vmatprep.subr.bf16.mxu1 %v2328_v48 }
 0x7dd   : > { %2102 = vmatpush3.bf16.msra.mxu1 %v2329_v42 }
 0x7de   : > { %2103 = vmatprep.subr.bf16.mxu1 %v2330_v38 }
 0x7e1   : > { %2104 = vmatpush3.bf16.msra.mxu1 %v2331_v43 }
 0x886   : > { %v1389_v60 = vpop.f32.mrf.mxu0 }
 0x887   : > { %v2812_v61 = vadd.f32 %v1389_v60, %v1270_v58 }
 0x888   : > { %v1391_v62 = vpop.f32.mrf.mxu0 }
 0x889   : > { %v1408_v63 = vmul.f32 %v2812_v61, %v2812_v61  ;;  %v2816_v1 = vadd.f32 %v1391_v62, %v1274_v59 }
 0x88a   : > { %v1393_v13 = vpop.f32.mrf.mxu0 }
 0x88b   : > { %v1416_v2 = vmul.f32 %v1408_v63, %v2812_v61  ;;  %v1409_v3 = vmul.f32 %v2816_v1, %v2816_v1  ;;  %v2821_v4 = vadd.f32 %v1393_v13, %v1270_v58 }
 0x88c   : > { %v1395_v5 = vpop.f32.mrf.mxu0 }
 0x88d   : > { %v1424_v6 = vmul.f32 0.044715, %v1416_v2  ;;  %v1417_v12 = vmul.f32 %v1409_v3, %v2816_v1  ;;  %v1410_v7 = vmul.f32 %v2821_v4, %v2821_v4  ;;  %v2826_v8 = vadd.f32 %v1395_v5, %v1274_v59 }
 0x88e   : > { %v1399_v9 = vpop.f32.mrf.mxu0 }
 0x88f   : > { %v1432_v10 = vadd.f32 %v1424_v6, %v2812_v61  ;;  %v1425_v14 = vmul.f32 0.044715, %v1417_v12  ;;  %v1418_v15 = vmul.f32 %v1410_v7, %v2821_v4  ;;  %v1411_v16 = vmul.f32 %v2826_v8, %v2826_v8 }
 0x890   : > { %v2832_v18 = vadd.f32 %v1399_v9, %v1270_v58  ;;  %v1401_v20 = vpop.f32.mrf.mxu0 }
 0x891   : > { %v1440_v23 = vmul.f32 0.7978846, %v1432_v10  ;;  %v1433_v19 = vadd.f32 %v1425_v14, %v2816_v1  ;;  %v1426_v28 = vmul.f32 0.044715, %v1418_v15  ;;  %v1419_v25 = vmul.f32 %v1411_v16, %v2826_v8 }
 0x892   : > { %v1412_v29 = vmul.f32 %v2832_v18, %v2832_v18  ;;  %v2838_v26 = vadd.f32 %v1401_v20, %v1274_v59  ;;  %v1403_v30 = vpop.f32.mrf.mxu0 }
 0x893   : > { %v1441_v27 = vmul.f32 0.7978846, %v1433_v19  ;;  %v1434_v31 = vadd.f32 %v1426_v28, %v2821_v4  ;;  %v1427_v32 = vmul.f32 0.044715, %v1419_v25  ;;  %2372 = vtanh.f32 %v1440_v23 }
 0x894   : > { %v1420_v34 = vmul.f32 %v1412_v29, %v2832_v18  ;;  %v1413_v35 = vmul.f32 %v2838_v26, %v2838_v26  ;;  %v1404_v33 = vadd.f32 %v1403_v30, %v1270_v58  ;;  %v1405_v0 = vpop.f32.mrf.mxu0 }
 0x895   : > { %2374 = vtanh.f32 %v1441_v27  ;;  %v1442_v37 = vmul.f32 0.7978846, %v1434_v31  ;;  %v1435_v39 = vadd.f32 %v1427_v32, %v2826_v8  ;;  %v1406_v40 = vadd.f32 %v1405_v0, %v1274_v59 }
 0x896   : > { %v1428_v41 = vmul.f32 0.044715, %v1420_v34  ;;  %v1421_v44 = vmul.f32 %v1413_v35, %v2838_v26  ;;  %v1414_v36 = vmul.f32 %v1404_v33, %v1404_v33 }
 0x897   : > { %2376 = vtanh.f32 %v1442_v37  ;;  %v1443_v45 = vmul.f32 0.7978846, %v1435_v39  ;;  %v1415_v46 = vmul.f32 %v1406_v40, %v1406_v40 }
 0x898   : > { %v1436_v47 = vadd.f32 %v1428_v41, %v2832_v18  ;;  %v1429_v48 = vmul.f32 0.044715, %v1421_v44  ;;  %v1422_v42 = vmul.f32 %v1414_v36, %v1404_v33  ;;  %v2332_v41 = vld [vmem:[%s2921_s7 + $0x38] sm:$0xff]   ;;  %v2337_v44 = vld [vmem:[%s2921_s7 + $0x10] sm:$0xff]   ;;  %v2338_v36 = vld [vmem:[%s2921_s7 + $0x8] sm:$0xff]  }
 0x899   : > { %2378 = vtanh.f32 %v1443_v45  ;;  %v1423_v38 = vmul.f32 %v1415_v46, %v1406_v40  ;;  %2211 = vmatpush3.bf16.msra.mxu0 %v2332_v41  ;;  %v2339_v45 = vld [vmem:[%s2921_s7] sm:$0xff]   ;;  %v1667_v46 = vsub.s32 5, %v2494_v11 }
 0x89a   : > { %v1444_v43 = vmul.f32 0.7978846, %v1436_v47  ;;  %v1437_v50 = vadd.f32 %v1429_v48, %v2838_v26  ;;  %v1430_v51 = vmul.f32 0.044715, %v1422_v42  ;;  %2212 = vmatprep.subr.bf16.mxu0 %v2398_v49 }
 0x89b   : > { %v1431_v52 = vmul.f32 0.044715, %v1423_v38  ;;  %v2388_v38 = vld [vmem:[%s2923_s9] sm:$0xff] }
 0x89c   : > { %2380 = vtanh.f32 %v1444_v43  ;;  %v1445_v53 = vmul.f32 0.7978846, %v1437_v50  ;;  %v1438_v54 = vadd.f32 %v1430_v51, %v1404_v33  ;;  %v1668_v43 = vrot.slane %v2388_v38, %v1667_v46 }
 0x89d   : > { %v1439_v55 = vadd.f32 %v1431_v52, %v1406_v40 }
 0x89e   : > { %2382 = vtanh.f32 %v1445_v53  ;;  %v1446_v56 = vmul.f32 0.7978846, %v1438_v54 }
 0x89f   : > { %v1447_v57 = vmul.f32 0.7978846, %v1439_v55 }
 0x8a0   : > { %2384 = vtanh.f32 %v1446_v56  ;;  %v2373_v58 = vpop.eup %2372 }
 0x8a1   : > { %2386 = vtanh.f32 %v1447_v57  ;;  %v1456_v63 = vadd.f32 1.0, %v2373_v58 }
 0x8a2   : > { %v2375_v59 = vpop.eup %2374 }
 0x8a3   : > { %v1457_v60 = vadd.f32 1.0, %v2375_v59  ;;  %v1464_v12 = vmul.f32 0.5, %v1456_v63 }
 0x8a4   : > { %v2377_v62 = vpop.eup %2376 }
 0x8a5   : > { %v1458_v13 = vadd.f32 1.0, %v2377_v62  ;;  %v1465_v6 = vmul.f32 0.5, %v1457_v60  ;;  %v1472_v20 = vmul.f32 %v1464_v12, %v2812_v61 }
 0x8a6   : > { %v2379_v2 = vpop.eup %2378 }
 0x8a7   : > { %v1466_v3 = vmul.f32 0.5, %v1458_v13  ;;  %v1459_v5 = vadd.f32 1.0, %v2379_v2  ;;  %v1473_v15 = vmul.f32 %v1465_v6, %v2816_v1 }
 0x8a9   : > { %v2381_v7 = vpop.eup %2380  ;;  %v1467_v9 = vmul.f32 0.5, %v1459_v5  ;;  %v1474_v10 = vmul.f32 %v1466_v3, %v2821_v4 }
 0x8aa   : > { %v1460_v19 = vadd.f32 1.0, %v2381_v7 }
 0x8ab   : > { %v2383_v14 = vpop.eup %2382  ;;  %v1475_v16 = vmul.f32 %v1467_v9, %v2826_v8  ;;  %v1480_v30 = vpack.c.bf16 %v1474_v10, %v1472_v20 }
 0x8ac   : > { %v1461_v23 = vadd.f32 1.0, %v2383_v14  ;;  %v1468_v34 = vmul.f32 0.5, %v1460_v19 }
 0x8ad   : > { %v2385_v28 = vpop.eup %2384  ;;  %v1481_v25 = vpack.c.bf16 %v1475_v16, %v1473_v15 }
 0x8ae   : > { %v2387_v29 = vpop.eup %2386  ;;  %v1462_v27 = vadd.f32 1.0, %v2385_v28  ;;  %v1469_v32 = vmul.f32 0.5, %v1461_v23  ;;  %v1476_v61 = vmul.f32 %v1468_v34, %v2832_v18  ;;  %v2334_v18 = vld [vmem:[%s2921_s7 + $0x28] sm:$0xff]  }
 0x8af   : > { %1644 = vmatprep.mubr.bf16.mxu1 %v1481_v25  ;;  %v1463_v31 = vadd.f32 1.0, %v2387_v29 }
 0x8b0   : > { %1645 = vmatmul.mubr.bf16.vlgmr.msra.gmra.mxu1 %v1480_v30  ;;  %v1470_v4 = vmul.f32 0.5, %v1462_v27  ;;  %v1477_v1 = vmul.f32 %v1469_v32, %v2838_v26  ;;  %v2335_v26 = vld [vmem:[%s2921_s7 + $0x20] sm:$0xff]  }
 0x8b1   : > { %v1471_v35 = vmul.f32 0.5, %v1463_v31 }
 0x8b2   : > { %v1478_v0 = vmul.f32 %v1470_v4, %v1404_v33  ;;  %v2333_v33 = vld [vmem:[%s2921_s7 + $0x30] sm:$0xff]  }
 0x8b3   : > { %v1479_v8 = vmul.f32 %v1471_v35, %v1406_v40  ;;  %2213 = vmatpush3.bf16.msra.mxu0 %v2333_v33  ;;  %v2336_v40 = vld [vmem:[%s2921_s7 + $0x18] sm:$0xff]  }
 0x8b4   : > { %v1482_v39 = vpack.c.bf16 %v1478_v0, %v1476_v61  ;;  %2214 = vmatprep.subr.bf16.mxu0 %v2398_v49 }
 0x8b5   : > { %v1483_v37 = vpack.c.bf16 %v1479_v8, %v1477_v1 }
 0x8b7   : > { %1652 = vmatprep.mubr.bf16.mxu1 %v1483_v37  ;;  %2215 = vmatpush3.bf16.msra.mxu0 %v2334_v18 }
 0x8b8   : > { %1653 = vmatmul.mubr.bf16.gmra.mxu1 %v1482_v39  ;;  %2216 = vmatprep.subr.bf16.mxu0 %v2398_v49 }
 0x8bb   : > { %2217 = vmatpush3.bf16.msra.mxu0 %v2335_v26 }
 0x8bc   : > { %2218 = vmatprep.subr.bf16.mxu0 %v2398_v49 }
 0x8bf   : > { %2219 = vmatpush3.bf16.msra.mxu0 %v2336_v40 }
 0x8c0   : > { %2220 = vmatprep.subr.bf16.mxu0 %v2398_v49 }
 0x8c3   : > { %2221 = vmatpush3.bf16.msra.mxu0 %v2337_v44 }
 0x8c4   : > { %2222 = vmatprep.subr.bf16.mxu0 %v2398_v49 }
 0x8c7   : > { %2223 = vmatpush3.bf16.msra.mxu0 %v2338_v36 }
 0x8c8   : > { %2224 = vmatprep.subr.bf16.mxu0 %v2398_v49 }
 0x8cb   : > { %2225 = vmatpush3.bf16.msra.mxu0 %v2339_v45 }
 0x970   : > { %v2105_v47 = vpop.f32.mrf.mxu1 }
 0x972   : > { %v2106_v48 = vpop.f32.mrf.mxu1 }
 0x973   : > { %v2107_v42 = vadd.f32 %v2106_v48, %v2105_v47 }
 0x974   : > { %v2108_v50 = vpop.f32.mrf.mxu1 }
 0x975   : > { %v1661_v51 = vadd.f32 %v2107_v42, %v2674_v17 }
 0x976   : > { %v2109_v49 = vpop.f32.mrf.mxu1 }
 0x977   : > { %v1669_v52 = vadd.f32 %v1668_v43, %v1661_v51  ;;  %v2110_v53 = vadd.f32 %v2109_v49, %v2108_v50 }
 0x978   : > { %v2111_v54 = vpop.f32.mrf.mxu1 }
 0x979   : > { %v1677_v55 = vcombine.high %v1669_v52, %v1669_v52  ;;  %v1686_v56 = vsel %vm1685_vm2, %v1669_v52, 0.0  ;;  %v1662_v11 = vadd.f32 %v2110_v53, %v2681_v22 }
 0x97a   : > { %v1687_v57 = vrot.slane %v1686_v56, 4  ;;  %v2112_v58 = vpop.f32.mrf.mxu1 }
 0x97b   : > { %v1693_v59 = vsel %vm1685_vm2, %v1677_v55, 0.0  ;;  %v1670_v60 = vadd.f32 %v1668_v43, %v1662_v11  ;;  %v2113_v62 = vadd.f32 %v2112_v58, %v2111_v54 }
 0x97c   : > { %v1688_v63 = vadd.f32 %v1687_v57, %v1686_v56  ;;  %v1694_v13 = vrot.slane %v1693_v59, 4  ;;  %v2114_v2 = vpop.f32.mrf.mxu1 }
 0x97d   : > { %v1678_v17 = vcombine.high %v1670_v60, %v1670_v60  ;;  %v1700_v3 = vsel %vm1685_vm2, %v1670_v60, 0.0  ;;  %v1663_v5 = vadd.f32 %v2113_v62, %v2678_v21 }
 0x97e   : > { %v1689_v6 = vrot.slane %v1688_v63, 2  ;;  %v1695_v12 = vadd.f32 %v1694_v13, %v1693_v59  ;;  %v1701_v7 = vrot.slane %v1700_v3, 4  ;;  %v2115_v9 = vpop.f32.mrf.mxu1 }
 0x97f   : > { %v1707_v22 = vsel %vm1685_vm2, %v1678_v17, 0.0  ;;  %v1671_v10 = vadd.f32 %v1668_v43, %v1663_v5  ;;  %v2116_v14 = vadd.f32 %v2115_v9, %v2114_v2 }
 0x980   : > { %v1690_v15 = vadd.f32 %v1689_v6, %v1688_v63  ;;  %v1696_v16 = vrot.slane %v1695_v12, 2  ;;  %v1702_v20 = vadd.f32 %v1701_v7, %v1700_v3  ;;  %v1708_v23 = vrot.slane %v1707_v22, 4 }
 0x981   : > { %v1679_v19 = vcombine.high %v1671_v10, %v1671_v10  ;;  %v1714_v28 = vsel %vm1685_vm2, %v1671_v10, 0.0  ;;  %v1664_v25 = vadd.f32 %v2116_v14, %v2686_v24 }
 0x982   : > { %v1691_v29 = vrot.slane %v1690_v15, 1  ;;  %v1697_v30 = vadd.f32 %v1696_v16, %v1695_v12  ;;  %v1703_v21 = vrot.slane %v1702_v20, 2  ;;  %v1709_v27 = vadd.f32 %v1708_v23, %v1707_v22 }
 0x983   : > { %v1715_v31 = vrot.slane %v1714_v28, 4  ;;  %v1721_v32 = vsel %vm1685_vm2, %v1679_v19, 0.0  ;;  %v1672_v34 = vadd.f32 %v1668_v43, %v1664_v25 }
 0x984   : > { %v1692_v4 = vadd.f32 %v1691_v29, %v1690_v15  ;;  %v1698_v35 = vrot.slane %v1697_v30, 1  ;;  %v1704_v0 = vadd.f32 %v1703_v21, %v1702_v20  ;;  %v1710_v1 = vrot.slane %v1709_v27, 2 }
 0x985   : > { %v1716_v8 = vadd.f32 %v1715_v31, %v1714_v28  ;;  %v1722_v61 = vrot.slane %v1721_v32, 4  ;;  %v1680_v37 = vcombine.high %v1672_v34, %v1672_v34  ;;  %v1728_v39 = vsel %vm1685_vm2, %v1672_v34, 0.0 }
 0x986   : > { %v1699_v41 = vadd.f32 %v1698_v35, %v1697_v30  ;;  %v1743_v24 = vmul.f32 0.25, %v1692_v4  ;;  %v1705_v33 = vrot.slane %v1704_v0, 1  ;;  %v1711_v18 = vadd.f32 %v1710_v1, %v1709_v27 }
 0x987   : > { %v1717_v26 = vrot.slane %v1716_v8, 2  ;;  %v1723_v40 = vadd.f32 %v1722_v61, %v1721_v32  ;;  %v1729_v44 = vrot.slane %v1728_v39, 4  ;;  %v1735_v36 = vsel %vm1685_vm2, %v1680_v37, 0.0 }
 0x988   : > { %v1744_v45 = vmul.f32 0.25, %v1699_v41  ;;  %v1751_v46 = vpack.c.bf16 %v1743_v24, %v1743_v24  ;;  %v1706_v47 = vadd.f32 %v1705_v33, %v1704_v0  ;;  %v1712_v48 = vrot.slane %v1711_v18, 1 }
 0x989   : > { %v1718_v42 = vadd.f32 %v1717_v26, %v1716_v8  ;;  %v1724_v38 = vrot.slane %v1723_v40, 2  ;;  %v1730_v43 = vadd.f32 %v1729_v44, %v1728_v39  ;;  %v1736_v50 = vrot.slane %v1735_v36, 4  ;;  %v2040_v8 = vld [vmem:[%s2922_s8] ss:$0 sm:$0xff] }
 0x98a   : > { %v1752_v51 = vpack.c.bf16 %v1744_v45, %v1744_v45  ;;  %v1713_v49 = vadd.f32 %v1712_v48, %v1711_v18  ;;  %v1745_v52 = vmul.f32 0.25, %v1706_v47  ;;  %v1790_v11 = vunpack.c.l.b16 %v1751_v46 }
 0x98b   : > { %v1719_v53 = vrot.slane %v1718_v42, 1  ;;  %v1725_v54 = vadd.f32 %v1724_v38, %v1723_v40  ;;  %v1731_v55 = vrot.slane %v1730_v43, 2  ;;  %v1737_v56 = vadd.f32 %v1736_v50, %v1735_v36 }
 0x98c   : > { %v1791_v57 = vunpack.c.l.b16 %v1752_v51  ;;  %v1746_v58 = vmul.f32 0.25, %v1713_v49  ;;  %v1753_v59 = vpack.c.bf16 %v1745_v52, %v1745_v52 }
 0x98d   : > { %v1720_v60 = vadd.f32 %v1719_v53, %v1718_v42  ;;  %v1726_v62 = vrot.slane %v1725_v54, 1  ;;  %v1732_v63 = vadd.f32 %v1731_v55, %v1730_v43  ;;  %v1738_v13 = vrot.slane %v1737_v56, 2 }
 0x98e   : > { %v1799_v2 = vsel %vm1798_vm3, %v1791_v57, %v1790_v11  ;;  %v1754_v17 = vpack.c.bf16 %v1746_v58, %v1746_v58  ;;  %v1792_v3 = vunpack.c.l.b16 %v1753_v59 }
 0x98f   : > { %v1727_v5 = vadd.f32 %v1726_v62, %v1725_v54  ;;  %v1747_v6 = vmul.f32 0.25, %v1720_v60  ;;  %v1733_v12 = vrot.slane %v1732_v63, 1  ;;  %v1739_v7 = vadd.f32 %v1738_v13, %v1737_v56 }
 0x990   : > { %v1793_v9 = vunpack.c.l.b16 %v1754_v17  ;;  %v1801_v22 = vsel %vm1800_vm4, %v1792_v3, %v1799_v2 }
 0x991   : > { %v1748_v10 = vmul.f32 0.25, %v1727_v5  ;;  %v1755_v14 = vpack.c.bf16 %v1747_v6, %v1747_v6  ;;  %v1734_v15 = vadd.f32 %v1733_v12, %v1732_v63  ;;  %v1740_v16 = vrot.slane %v1739_v7, 1 }
 0x992   : > { %v1803_v20 = vsel %vm1802_vm5, %v1793_v9, %v1801_v22 }
 0x993   : > { %v1756_v23 = vpack.c.bf16 %v1748_v10, %v1748_v10  ;;  %v1794_v19 = vunpack.c.l.b16 %v1755_v14  ;;  %v1741_v28 = vadd.f32 %v1740_v16, %v1739_v7  ;;  %v1749_v25 = vmul.f32 0.25, %v1734_v15 }
 0x995   : > { %v1795_v29 = vunpack.c.l.b16 %v1756_v23  ;;  %v1805_v30 = vsel %vm1804_vm6, %v1794_v19, %v1803_v20  ;;  %v1750_v21 = vmul.f32 0.25, %v1741_v28  ;;  %v1757_v27 = vpack.c.bf16 %v1749_v25, %v1749_v25 }
 0x997   : > { %v1758_v31 = vpack.c.bf16 %v1750_v21, %v1750_v21  ;;  %v1796_v32 = vunpack.c.l.b16 %v1757_v27  ;;  %v1807_v34 = vsel %vm1806_vm7, %v1795_v29, %v1805_v30 }
 0x999   : > { %v1797_v4 = vunpack.c.l.b16 %v1758_v31  ;;  %v1809_v35 = vsel %vm1808_vm8, %v1796_v32, %v1807_v34 }
 0x99b   : > { %v1811_v0 = vsel %vm1810_vm9, %v1797_v4, %v1809_v35 }
 0x99c   : > { %v1812_v1 = vpack.c.b16 %v1811_v0, %v1811_v0 }
 0x99e   : > { %2227 = vmatmul.mubr.bf16.vlgmr.msra.gmra.mxu0 %v1812_v1 }
 0xa5e   : > { %v1896_v61 = vpop.f32.mrf.mxu0 }
 0xa5f   : > { %v1897_v37 = vadd.f32 %v2040_v8, %v1896_v61 }
 0xa60   : > { %v2228_v39 = vpop.f32.mrf.mxu0 }
 0xa61   : > { %1902 = vst [vmem:[%s359_s11] sm:$0xff] %v1897_v37 }
 0xa62   : > { %v1899_v41 = vpop.f32.mrf.mxu0 }
 0xa64   : > { %v2229_v24 = vpop.f32.mrf.mxu0 }
 0xa65 PF: > { %s20_s13 = sadd.s32 1, %s2395_s13  }
 0xa66   : > { %p17_p5 = scmp.ge.s32.totalorder %s20_s13, 4  }
 0xa68   :  { %19 = sbr.rel (!%p17_p5) target bundleno = 1 (0x1), region = 90 }

// kernel: three_view_net_forward.3
= control target key start
LH: loop header
LB: loop body
LE: loop exit
PB: predicated region body
PF: predicated region fallthrough
CT: control target
= control target key end

     0   :  { %s2536_s0 = inlined_call_operand.vmem [shape: bf16[32,128], index: 0, kind: input, shape index: {}]   ;;  %s2537_s1 = inlined_call_operand.vmem [shape: f32[16,128], index: 1, kind: input, shape index: {}]   ;;  %s2538_s2 = inlined_call_operand.vmem [shape: bf16[128,128], index: 2, kind: input, shape index: {}]   ;;  %s2539_s3 = inlined_call_operand.vmem [shape: bf16[128,384], index: 3, kind: input, shape index: {}]   ;;  %s2540_s4 = inlined_call_operand.vmem [shape: bf16[128,128], index: 4, kind: input, shape index: {}]   ;;  %s2541_s5 = inlined_call_operand.vmem [shape: bf16[128,256], index: 5, kind: input, shape index: {}]   ;;  %s2542_s6 = inlined_call_operand.vmem [shape: bf16[256,128], index: 6, kind: input, shape index: {}]   ;;  %s2543_s7 = inlined_call_operand.vmem [shape: bf16[128,128], index: 7, kind: input, shape index: {}]   ;;  %s2544_s8 = inlined_call_operand.vmem [shape: f32[1,128], index: 8, kind: input, shape index: {}]   ;;  %s2545_s9 = inlined_call_operand.vmem [shape: f32[8,128], index: 9, kind: input, shape index: {}]   ;;  %s2546_s10 = inlined_call_operand.hbm [shape: f32[8,128], index: 10, kind: output, shape index: {}]  }
   0x1   :  { %v1862_v0 = vld [vmem:[%s2538_s2 + $0x38] sm:$0xff]   ;;  %v1863_v1 = vld [vmem:[%s2538_s2 + $0x30] sm:$0xff]   ;;  %v1864_v2 = vld [vmem:[%s2538_s2 + $0x28] sm:$0xff]  }
   0x2   :  { %1753 = vmatprep.subr.bf16.mxu0 %v1862_v0  ;;  %v1865_v3 = vld [vmem:[%s2538_s2 + $0x20] sm:$0xff]   ;;  %v1866_v5 = vld [vmem:[%s2538_s2 + $0x18] sm:$0xff]   ;;  %v1867_v6 = vld [vmem:[%s2538_s2 + $0x10] sm:$0xff]  }
   0x3   :  { %1754 = vmatpush3.bf16.msra.mxu0 %v1862_v0  ;;  %v1870_v4 = vld [vmem:[%s2536_s0] sm:$0xff]   ;;  %v1868_v7 = vld [vmem:[%s2538_s2 + $0x8] sm:$0xff]  }
   0x4   :  { %1755 = vmatprep.subr.bf16.mxu0 %v1863_v1  ;;  %1769 = vmatprep.mubr.bf16.mxu0 %v1870_v4  ;;  %v1869_v8 = vld [vmem:[%s2538_s2] sm:$0xff]   ;;  %v1871_v9 = vld [vmem:[%s2536_s0 + $0x8] sm:$0xff]  }
   0x7   :  { %1756 = vmatpush3.bf16.msra.mxu0 %v1863_v1 }
   0x8   :  { %1757 = vmatprep.subr.bf16.mxu0 %v1864_v2 }
   0xb   :  { %1758 = vmatpush3.bf16.msra.mxu0 %v1864_v2 }
   0xc   :  { %1759 = vmatprep.subr.bf16.mxu0 %v1865_v3 }
   0xf   :  { %1760 = vmatpush3.bf16.msra.mxu0 %v1865_v3 }
  0x10   :  { %1761 = vmatprep.subr.bf16.mxu0 %v1866_v5 }
  0x13   :  { %1762 = vmatpush3.bf16.msra.mxu0 %v1866_v5 }
  0x14   :  { %1763 = vmatprep.subr.bf16.mxu0 %v1867_v6 }
  0x17   :  { %1764 = vmatpush3.bf16.msra.mxu0 %v1867_v6 }
  0x18   :  { %1765 = vmatprep.subr.bf16.mxu0 %v1868_v7 }
  0x1b   :  { %1766 = vmatpush3.bf16.msra.mxu0 %v1868_v7 }
  0x1c   :  { %1767 = vmatprep.subr.bf16.mxu0 %v1869_v8 }
  0x1f   :  { %1768 = vmatpush3.bf16.msra.mxu0 %v1869_v8 }
  0x22   :  { %1770 = vmatmul.mubr.bf16.vlgmr.msra.gmra.mxu0 %v1871_v9 }
  0x23   :  { %15 = vsyncpa [#allocation3], 0  ;;  %v44_v10 = vlaneseq  ;;  %v2129_v13 = vld [vmem:[%s2545_s9] sm:$0xff]  ;;  %v182_v22 = vld [vmem:[%s2537_s1 + $0x8] sm:$0xff]  ;;  %v2031_v0 = vmov 0   ;;  %vm2033_vm0 = vmmov 0  }
  0x24   :  { %v181_v16 = vld [vmem:[%s2537_s1] sm:$0xff]  ;;  %v1872_v29 = vld [vmem:[%s2539_s3 + $0xac] ss:$12 sps:$4 sm:$0xff]   ;;  %v1874_v30 = vld [vmem:[%s2539_s3 + $0xa8] ss:$12 sps:$4 sm:$0xff]   ;;  %442 = vmatprep.mubr.bf16.mxu1 %v2031_v0  ;;  %vm600_vm1 = vcmask 130048  }
  0x25   :  { %v2121_v11 = vshrl.u32 %v44_v10, 7  ;;  %410 = vmatprep.subr.bf16.mxu1 %v1872_v29  ;;  %v1875_v47 = vld [vmem:[%s2539_s3 + $0x94] ss:$12 sps:$4 sm:$0xff]   ;;  %v1877_v48 = vld [vmem:[%s2539_s3 + $0xb0] ss:$12 sps:$4 sm:$0xff]   ;;  %vm1361_vm2 = vcmask 1043456  }
  0x26   :  { %411 = vmatpush1.bf16.msra.mxu1 %v1874_v30  ;;  %v1878_v49 = vld [vmem:[%s2539_s3 + $0x90] ss:$12 sps:$4 sm:$0xff]   ;;  %1773 = vmatprep.subr.bf16.mxu0 %v1877_v48  ;;  %v1881_v51 = vld [vmem:[%s2539_s3 + $0x98] ss:$12 sps:$4 sm:$0xff]   ;;  %v1885_v54 = vld [vmem:[%s2539_s3 + $0x80] ss:$12 sps:$4 sm:$0xff]  }
  0x27   :  { %v2124_v12 = vsub.s32 0, %v2121_v11  ;;  %412 = vmatprep.subr.bf16.mxu1 %v1875_v47  ;;  %1774 = vmatpush3.bf16.msra.mxu0 %v1877_v48  ;;  %v1879_v50 = vld [vmem:[%s2539_s3 + $0x7c] ss:$12 sps:$4 sm:$0xff]   ;;  %v1882_v52 = vld [vmem:[%s2539_s3 + $0x78] ss:$12 sps:$4 sm:$0xff]   ;;  %v242_v29 = vsub.s32 2, %v2121_v11 }
  0x28   :  { %1775 = vmatprep.subr.bf16.mxu0 %v1881_v51  ;;  %v1883_v53 = vld [vmem:[%s2539_s3 + $0x64] ss:$12 sps:$4 sm:$0xff]   ;;  %v1886_v55 = vld [vmem:[%s2539_s3 + $0x60] ss:$12 sps:$4 sm:$0xff]   ;;  %v1889_v57 = vld [vmem:[%s2539_s3 + $0x68] ss:$12 sps:$4 sm:$0xff]  }
  0x29   :  { %v71_v14 = vrot.slane %v2129_v13, %v2124_v12  ;;  %v1887_v56 = vld [vmem:[%s2539_s3 + $0x4c] ss:$12 sps:$4 sm:$0xff]   ;;  %v1890_v58 = vld [vmem:[%s2539_s3 + $0x48] ss:$12 sps:$4 sm:$0xff]   ;;  %v1893_v60 = vld [vmem:[%s2539_s3 + $0x50] ss:$12 sps:$4 sm:$0xff]  }
  0x2a   :  { %413 = vmatpush1.bf16.msra.mxu1 %v1878_v49  ;;  %v1891_v59 = vld [vmem:[%s2539_s3 + $0x34] ss:$12 sps:$4 sm:$0xff]   ;;  %v1894_v61 = vld [vmem:[%s2539_s3 + $0x30] ss:$12 sps:$4 sm:$0xff]   ;;  %v1897_v63 = vld [vmem:[%s2539_s3 + $0x38] ss:$12 sps:$4 sm:$0xff]  }
  0x2b   :  { %414 = vmatprep.subr.bf16.mxu1 %v1879_v50  ;;  %1776 = vmatpush3.bf16.msra.mxu0 %v1881_v51  ;;  %v1895_v62 = vld [vmem:[%s2539_s3 + $0x1c] ss:$12 sps:$4 sm:$0xff]   ;;  %v1898_v1 = vld [vmem:[%s2539_s3 + $0x18] ss:$12 sps:$4 sm:$0xff]   ;;  %v1901_v3 = vld [vmem:[%s2539_s3 + $0x20] ss:$12 sps:$4 sm:$0xff]  }
  0x2c   :  { %1777 = vmatprep.subr.bf16.mxu0 %v1885_v54  ;;  %v1899_v2 = vld [vmem:[%s2539_s3 + $0x4] ss:$12 sps:$4 sm:$0xff]   ;;  %v1902_v4 = vld [vmem:[%s2539_s3] ss:$12 sps:$4 sm:$0xff]   ;;  %v1903_v5 = vld [vmem:[%s2539_s3 + $0x8] ss:$12 sps:$4 sm:$0xff]  }
  0x2d   :  { %v2032_v49 = vmov 0.0   ;;  %vm1474_vm3 = vcmask 1041409   ;;  %vm1476_vm4 = vcmask 1042434   ;;  %vm1478_vm5 = vcmask 1043459   ;;  %s2035_s0 = smov [#allocation2]  }
  0x2e   :  { %415 = vmatpush1.bf16.msra.mxu1 %v1882_v52  ;;  %vm1480_vm6 = vcmask 1044484   ;;  %vm1482_vm7 = vcmask 1045509   ;;  %vm1484_vm8 = vcmask 1046534   ;;  %vm1486_vm9 = vcmask 1047559   ;;  %s1585_s15 = sshll.u32 %s2035_s0, 4  ;;  %s1586_s15 = int_to_ptr.vmem [resolvable:$true] %s1585_s15 }
  0x2f   :  { %416 = vmatprep.subr.bf16.mxu1 %v1883_v53  ;;  %1778 = vmatpush3.bf16.msra.mxu0 %v1885_v54  ;;  %s2009_s16 = scalar_lea.vmem %s1586_s15, 128  ;;  %p2014_p1 = scmp.lt.s32.totalorder %s1586_s15, %s1586_s15 }
  0x30   :  { %1779 = vmatprep.subr.bf16.mxu0 %v1889_v57  ;;  %p2010_p0 = scmp.ne.s32.totalorder %s1586_s15, %s2009_s16  ;;  %p2015_p2 = scmp.lt.s32.totalorder %s2009_s16, %s2009_s16 }
  0x32   :  { %417 = vmatpush1.bf16.msra.mxu1 %v1886_v55  ;;  %p2016_p3 = por %p2015_p2, %p2014_p1 }
  0x33   :  { %418 = vmatprep.subr.bf16.mxu1 %v1887_v56  ;;  %1780 = vmatpush3.bf16.msra.mxu0 %v1889_v57 }
  0x34   :  { %1781 = vmatprep.subr.bf16.mxu0 %v1893_v60  ;;  %p2017_p4 = pnand %p2016_p3, %p2010_p0 }
  0x36   :  { %419 = vmatpush1.bf16.msra.mxu1 %v1890_v58 }
  0x37   :  { %420 = vmatprep.subr.bf16.mxu1 %v1891_v59  ;;  %1782 = vmatpush3.bf16.msra.mxu0 %v1893_v60 }
  0x38   :  { %1783 = vmatprep.subr.bf16.mxu0 %v1897_v63 }
  0x3a   :  { %421 = vmatpush1.bf16.msra.mxu1 %v1894_v61 }
  0x3b   :  { %422 = vmatprep.subr.bf16.mxu1 %v1895_v62  ;;  %1784 = vmatpush3.bf16.msra.mxu0 %v1897_v63 }
  0x3c   :  { %1785 = vmatprep.subr.bf16.mxu0 %v1901_v3 }
  0x3e   :  { %423 = vmatpush1.bf16.msra.mxu1 %v1898_v1 }
  0x3f   :  { %424 = vmatprep.subr.bf16.mxu1 %v1899_v2  ;;  %1786 = vmatpush3.bf16.msra.mxu0 %v1901_v3 }
  0x40   :  { %1787 = vmatprep.subr.bf16.mxu0 %v1903_v5 }
  0x42   :  { %425 = vmatpush1.bf16.msra.mxu1 %v1902_v4 }
  0x43   :  { %1788 = vmatpush3.bf16.msra.mxu0 %v1903_v5  ;;  %1793 = vmatprep.subr.bf16.mxu1 %v2032_v49 }
  0x44   :  { %1811 = vmatprep.subr.bf16.mxu0 %v2032_v49 }
  0xe2   :  { %v1771_v15 = vpop.f32.mrf.mxu0 }
  0xe3   :  { %v175_v17 = vadd.f32 %v1771_v15, %v71_v14 }
  0xe4   :  { %v166_v18 = vpop.f32.mrf.mxu0 }
  0xe5   :  { %v2136_v19 = vadd.f32 %v181_v16, %v175_v17  ;;  %v167_v20 = vadd.f32 %v166_v18, %v71_v14 }
  0xe6   :  { %v1772_v21 = vpop.f32.mrf.mxu0 }
  0xe7   :  { %v2141_v23 = vadd.f32 %v181_v16, %v167_v20  ;;  %v178_v24 = vadd.f32 %v1772_v21, %v71_v14  ;;  %191 = vadd.xlane.f32.xlu1 %v2136_v19 }
  0xe8   :  { %v169_v25 = vpop.f32.mrf.mxu0 }
  0xe9   :  { %v2144_v26 = vadd.f32 %v182_v22, %v178_v24  ;;  %v170_v27 = vadd.f32 %v169_v25, %v71_v14  ;;  %187 = vadd.xlane.f32.xlu0 %v2141_v23 }
  0xeb   :  { %v2147_v28 = vadd.f32 %v182_v22, %v170_v27  ;;  %193 = vadd.xlane.f32.xlu1 %v2144_v26  ;;  %v234_v22 = vsub.s32 1, %v2121_v11 }
  0xed   :  { %189 = vadd.xlane.f32.xlu0 %v2147_v28  ;;  %v235_v27 = vrot.slane %v2129_v13, %v234_v22 }
 0x170   :  { %v192_v31 = vpop.xlane.xlu1 %191 }
 0x171   :  { %v198_v33 = vmul.f32 0.0078125, %v192_v31 }
 0x172   :  { %v188_v32 = vpop.xlane.xlu0 %187 }
 0x173   :  { %v196_v34 = vmul.f32 0.0078125, %v188_v32  ;;  %v2161_v38 = vsub.f32 %v2136_v19, %v198_v33 }
 0x174   :  { %v194_v35 = vpop.xlane.xlu1 %193 }
 0x175   :  { %v2158_v36 = vsub.f32 %v2141_v23, %v196_v34  ;;  %v199_v39 = vmul.f32 0.0078125, %v194_v35  ;;  %v206_v44 = vmul.f32 %v2161_v38, %v2161_v38  ;;  %v243_v34 = vrot.slane %v2129_v13, %v242_v29 }
 0x176   :  { %v190_v37 = vpop.xlane.xlu0 %189 }
 0x177   :  { %v197_v40 = vmul.f32 0.0078125, %v190_v37  ;;  %v204_v41 = vmul.f32 %v2158_v36, %v2158_v36  ;;  %v2169_v43 = vsub.f32 %v2144_v26, %v199_v39 }
 0x179   :  { %v2166_v42 = vsub.f32 %v2147_v28, %v197_v40  ;;  %208 = vadd.xlane.f32.xlu0 %v204_v41  ;;  %v207_v46 = vmul.f32 %v2169_v43, %v2169_v43 }
 0x17b   :  { %v205_v45 = vmul.f32 %v2166_v42, %v2166_v42 }
 0x17d   :  { %212 = vadd.xlane.f32.xlu0 %v206_v44  ;;  %210 = vadd.xlane.f32.xlu1 %v205_v45 }
 0x181   :  { %214 = vadd.xlane.f32.xlu1 %v207_v46 }
 0x202   :  { %v209_v6 = vpop.xlane.xlu0 %208 }
 0x203   :  { %v216_v7 = vmul.f32 0.0078125, %v209_v6 }
 0x205   :  { %v220_v8 = vadd.f32 1e-05, %v216_v7 }
 0x206   :  { %v211_v9 = vpop.xlane.xlu1 %210  ;;  %v213_v10 = vpop.xlane.xlu0 %212 }
 0x207   :  { %1960 = vrsqrt.f32 %v220_v8  ;;  %v217_v14 = vmul.f32 0.0078125, %v211_v9  ;;  %v218_v15 = vmul.f32 0.0078125, %v213_v10 }
 0x209   :  { %v221_v16 = vadd.f32 1e-05, %v217_v14  ;;  %v222_v17 = vadd.f32 1e-05, %v218_v15 }
 0x20a   :  { %v215_v18 = vpop.xlane.xlu1 %214 }
 0x20b   :  { %1962 = vrsqrt.f32 %v221_v16  ;;  %v219_v20 = vmul.f32 0.0078125, %v215_v18 }
 0x20c   :  { %1964 = vrsqrt.f32 %v222_v17 }
 0x20d   :  { %v223_v21 = vadd.f32 1e-05, %v219_v20 }
 0x20f   :  { %1966 = vrsqrt.f32 %v223_v21 }
 0x214   :  { %v1961_v24 = vpop.eup %1960 }
 0x215   :  { %v228_v25 = vmul.f32 %v1961_v24, %v2158_v36 }
 0x217   :  { %v236_v33 = vmul.f32 %v235_v27, %v228_v25 }
 0x218   :  { %v1963_v30 = vpop.eup %1962 }
 0x219   :  { %v1965_v31 = vpop.eup %1964  ;;  %v229_v32 = vmul.f32 %v1963_v30, %v2166_v42  ;;  %v244_v40 = vadd.f32 %v243_v34, %v236_v33 }
 0x21a   :  { %v230_v35 = vmul.f32 %v1965_v31, %v2161_v38 }
 0x21b   :  { %v237_v37 = vmul.f32 %v235_v27, %v229_v32 }
 0x21c   :  { %v1967_v39 = vpop.eup %1966  ;;  %v238_v36 = vmul.f32 %v235_v27, %v230_v35 }
 0x21d   :  { %v245_v41 = vadd.f32 %v243_v34, %v237_v37  ;;  %v231_v44 = vmul.f32 %v1967_v39, %v2169_v43 }
 0x21e   :  { %v246_v47 = vadd.f32 %v243_v34, %v238_v36 }
 0x21f   :  { %v248_v45 = vpack.c.bf16 %v245_v41, %v244_v40  ;;  %v239_v46 = vmul.f32 %v235_v27, %v231_v44 }
 0x221   :  { %443 = vmatmul.mubr.bf16.vlgmr.msra.gmra.mxu1 %v248_v45  ;;  %1789 = vmatprep.mubr.bf16.mxu0 %v248_v45  ;;  %v247_v48 = vadd.f32 %v243_v34, %v239_v46  ;;  %v1904_v45 = vld [vmem:[%s2540_s4 + $0x38] sm:$0xff]  }
 0x222   :  { %452 = vmatprep.mubr.bf16.mxu1 %v2031_v0 }
 0x223   :  { %v249_v42 = vpack.c.bf16 %v247_v48, %v246_v47 }
 0x225   :  { %1790 = vmatmul.mubr.bf16.vlgmr.msra.gmra.mxu0 %v249_v42 }
 0x226   :  { %1813 = vmatprep.mubr.msk.bf16.mxu0 %vm2033_vm0, %v2032_v49 }
 0x229   :  { %453 = vmatmul.mubr.bf16.gmra.mxu1 %v249_v42 }
 0x22a   :  { %1795 = vmatprep.mubr.msk.bf16.mxu1 %vm2033_vm0, %v2032_v49 }
 0x2e1   :  { %v444_v38 = vpop.f32.mrf.mxu1 }
 0x2e3   :  { %v446_v43 = vpop.f32.mrf.mxu1 }
 0x2e5   :  { %v448_v50 = vpop.f32.mrf.mxu1  ;;  %v1791_v51 = vpop.f32.mrf.mxu0 }
 0x2e6   :  { %v512_v60 = vpack.c.bf16 %v448_v50, %v444_v38 }
 0x2e7   :  { %v450_v52 = vpop.f32.mrf.mxu1  ;;  %v497_v53 = vpop.f32.mrf.mxu0 }
 0x2e8   :  { %v513_v54 = vpack.c.bf16 %v450_v52, %v446_v43 }
 0x2e9   :  { %v454_v55 = vpop.f32.mrf.mxu1  ;;  %v1792_v56 = vpop.f32.mrf.mxu0 }
 0x2ea   :  { %v517_v57 = vpack.c.bf16 %v1792_v56, %v1791_v51  ;;  %1794 = vmatpush3.bf16.xpose.msra.mxu1 %v513_v54 }
 0x2eb   :  { %v456_v58 = vpop.f32.mrf.mxu1  ;;  %1799 = vmatprep.subr.bf16.mxu1 %v2032_v49  ;;  %v500_v63 = vpop.f32.mrf.mxu0 }
 0x2ec   :  { %1812 = vmatpush3.bf16.msra.mxu0 %v517_v57  ;;  %v514_v2 = vpack.c.bf16 %v500_v63, %v497_v53  ;;  %v1905_v53 = vld [vmem:[%s2540_s4 + $0x30] sm:$0xff]   ;;  %v1910_v63 = vld [vmem:[%s2540_s4 + $0x8] sm:$0xff]  }
 0x2ed   :  { %v458_v59 = vpop.f32.mrf.mxu1 }
 0x2ee   :  { %v515_v1 = vpack.c.bf16 %v458_v59, %v454_v55  ;;  %v1906_v55 = vld [vmem:[%s2540_s4 + $0x28] sm:$0xff]  }
 0x2ef   :  { %v460_v61 = vpop.f32.mrf.mxu1 }
 0x2f0   :  { %v516_v62 = vpack.c.bf16 %v460_v61, %v456_v58  ;;  %v1908_v61 = vld [vmem:[%s2540_s4 + $0x18] sm:$0xff]  }
 0x2f1   :  { %1796 = vmatmul.mubr.bf16.vlgmr.msra.gmra.mxu1 %v512_v60  ;;  %v1907_v60 = vld [vmem:[%s2540_s4 + $0x20] sm:$0xff]  }
 0x2f2   :  { %1800 = vmatpush3.bf16.xpose.msra.mxu1 %v516_v62  ;;  %1801 = vmatprep.mubr.msk.bf16.mxu1 %vm2033_vm0, %v2032_v49  ;;  %v1909_v62 = vld [vmem:[%s2540_s4 + $0x10] sm:$0xff]  }
 0x2f3   :  { %1805 = vmatprep.subr.bf16.mxu1 %v2032_v49 }
 0x2f9   :  { %1802 = vmatmul.mubr.bf16.vlgmr.msra.gmra.mxu1 %v515_v1  ;;  %v1911_v1 = vld [vmem:[%s2540_s4] sm:$0xff]  }
 0x2fa   :  { %1806 = vmatpush3.bf16.msra.mxu1 %v514_v2  ;;  %1807 = vmatprep.mubr.msk.bf16.mxu1 %vm2033_vm0, %v2032_v49 }
 0x2fb   :  { %1817 = vmatprep.subr.bf16.mxu1 %v1904_v45 }
 0x3b1   :  { %v552_v3 = vpop.f32.mrf.mxu1 }
 0x3b2   :  { %v601_v4 = vsel %vm600_vm1, %v552_v3, -inf }
 0x3b3   :  { %602 = vmax.xlane.f32.xlu0 %v601_v4  ;;  %v1797_v5 = vpop.f32.mrf.mxu1 }
 0x3b5   :  { %v555_v6 = vpop.f32.mrf.mxu1 }
 0x3b6   :  { %v604_v7 = vsel %vm600_vm1, %v555_v6, -inf }
 0x3b7   :  { %605 = vmax.xlane.f32.xlu1 %v604_v7  ;;  %v1798_v8 = vpop.f32.mrf.mxu1 }
 0x3b9   :  { %v593_v9 = vpop.f32.mrf.mxu1 }
 0x3ba   :  { %v607_v10 = vsel %vm600_vm1, %v593_v9, -inf }
 0x3bb   :  { %608 = vmax.xlane.f32.xlu0 %v607_v10  ;;  %v1803_v14 = vpop.f32.mrf.mxu1 }
 0x3bd   :  { %v596_v15 = vpop.f32.mrf.mxu1 }
 0x3be   :  { %v610_v16 = vsel %vm600_vm1, %v596_v15, -inf }
 0x3bf   :  { %611 = vmax.xlane.f32.xlu1 %v610_v16  ;;  %v1804_v17 = vpop.f32.mrf.mxu1 }
 0x43c   :  { %v603_v18 = vpop.xlane.xlu0 %602 }
 0x43d   :  { %v613_v20 = vsub.f32 %v552_v3, %v603_v18 }
 0x43f   :  { %v617_v21 = vmul.f32 1.442695, %v613_v20 }
 0x440   :  { %v606_v22 = vpop.xlane.xlu1 %605 }
 0x441   :  { %1968 = vpow2.f32 %v617_v21  ;;  %v614_v24 = vsub.f32 %v555_v6, %v606_v22 }
 0x443   :  { %v619_v25 = vmul.f32 1.442695, %v614_v24 }
 0x444   :  { %v609_v27 = vpop.xlane.xlu0 %608 }
 0x445   :  { %1970 = vpow2.f32 %v619_v25  ;;  %v615_v29 = vsub.f32 %v593_v9, %v609_v27 }
 0x447   :  { %v621_v30 = vmul.f32 1.442695, %v615_v29 }
 0x448   :  { %v612_v31 = vpop.xlane.xlu1 %611 }
 0x449   :  { %1972 = vpow2.f32 %v621_v30  ;;  %v616_v32 = vsub.f32 %v596_v15, %v612_v31 }
 0x44b   :  { %v623_v33 = vmul.f32 1.442695, %v616_v32 }
 0x44d   :  { %1974 = vpow2.f32 %v623_v33 }
 0x44e   :  { %v1969_v34 = vpop.eup %1968 }
 0x44f   :  { %v625_v35 = vsel %vm600_vm1, %v1969_v34, 0.0 }
 0x450   :  { %626 = vadd.xlane.f32.xlu0 %v625_v35 }
 0x452   :  { %v1971_v37 = vpop.eup %1970 }
 0x453   :  { %v628_v39 = vsel %vm600_vm1, %v1971_v37, 0.0 }
 0x454   :  { %629 = vadd.xlane.f32.xlu1 %v628_v39 }
 0x456   :  { %v1973_v40 = vpop.eup %1972 }
 0x457   :  { %v631_v41 = vsel %vm600_vm1, %v1973_v40, 0.0 }
 0x458   :  { %632 = vadd.xlane.f32.xlu0 %v631_v41 }
 0x45a   :  { %v1975_v44 = vpop.eup %1974 }
 0x45b   :  { %v634_v36 = vsel %vm600_vm1, %v1975_v44, 0.0 }
 0x45c   :  { %635 = vadd.xlane.f32.xlu1 %v634_v36  ;;  %v1917_v36 = vld [vmem:[%s2541_s5 + $0x64] ss:$8 sps:$4 sm:$0xff]  }
 0x4d9   :  { %v627_v46 = vpop.xlane.xlu0 %626 }
 0x4da   :  { %1976 = vrcp.f32 %v627_v46  ;;  %v1920_v46 = vld [vmem:[%s2541_s5 + $0x54] ss:$8 sps:$4 sm:$0xff]  }
 0x4dd   :  { %v630_v47 = vpop.xlane.xlu1 %629 }
 0x4de   :  { %1978 = vrcp.f32 %v630_v47  ;;  %v1918_v47 = vld [vmem:[%s2541_s5 + $0x50] ss:$8 sps:$4 sm:$0xff]  }
 0x4e1   :  { %v633_v48 = vpop.xlane.xlu0 %632 }
 0x4e2   :  { %1980 = vrcp.f32 %v633_v48  ;;  %v1923_v48 = vld [vmem:[%s2541_s5 + $0x44] ss:$8 sps:$4 sm:$0xff]  }
 0x4e5   :  { %v636_v42 = vpop.xlane.xlu1 %635 }
 0x4e6   :  { %1982 = vrcp.f32 %v636_v42  ;;  %v1921_v42 = vld [vmem:[%s2541_s5 + $0x40] ss:$8 sps:$4 sm:$0xff]  }
 0x4e7   :  { %v1977_v38 = vpop.eup %1976 }
 0x4e8   :  { %v641_v50 = vmul.f32 %v1977_v38, %v1969_v34  ;;  %v1924_v38 = vld [vmem:[%s2541_s5 + $0x30] ss:$8 sps:$4 sm:$0xff]  }
 0x4eb   :  { %v1979_v43 = vpop.eup %1978 }
 0x4ec   :  { %v642_v51 = vmul.f32 %v1979_v43, %v1971_v37  ;;  %v1926_v43 = vld [vmem:[%s2541_s5 + $0x34] ss:$8 sps:$4 sm:$0xff]  }
 0x4ee   :  { %v645_v52 = vpack.c.bf16 %v642_v51, %v641_v50  ;;  %v1929_v50 = vld [vmem:[%s2541_s5 + $0x24] ss:$8 sps:$4 sm:$0xff]   ;;  %v1927_v51 = vld [vmem:[%s2541_s5 + $0x20] ss:$8 sps:$4 sm:$0xff]  }
 0x4ef   :  { %v1981_v54 = vpop.eup %1980 }
 0x4f0   :  { %1808 = vmatmul.mubr.msk.bf16.vlgmr.msra.gmra.mxu1 %vm600_vm1, %v645_v52  ;;  %v643_v57 = vmul.f32 %v1981_v54, %v1973_v40  ;;  %v1932_v52 = vld [vmem:[%s2541_s5 + $0x14] ss:$8 sps:$4 sm:$0xff]   ;;  %v1935_v54 = vld [vmem:[%s2541_s5 + $0x4] ss:$8 sps:$4 sm:$0xff]  }
 0x4f1   :  { %1818 = vmatpush3.bf16.msra.mxu1 %v1904_v45  ;;  %v1915_v45 = vld [vmem:[%s2541_s5 + $0x60] ss:$8 sps:$4 sm:$0xff]  }
 0x4f2   :  { %1819 = vmatprep.subr.bf16.mxu1 %v1905_v53 }
 0x4f3   :  { %v1983_v56 = vpop.eup %1982 }
 0x4f4   :  { %v644_v58 = vmul.f32 %v1983_v56, %v1975_v44 }
 0x4f5   :  { %1820 = vmatpush3.bf16.msra.mxu1 %v1905_v53  ;;  %v1930_v53 = vld [vmem:[%s2541_s5 + $0x10] ss:$8 sps:$4 sm:$0xff]  }
 0x4f6   :  { %v646_v59 = vpack.c.bf16 %v644_v58, %v643_v57  ;;  %1821 = vmatprep.subr.bf16.mxu1 %v1906_v55 }
 0x4f8   :  { %1814 = vmatmul.mubr.msk.bf16.vlgmr.msra.gmra.mxu0 %vm600_vm1, %v646_v59 }
 0x4f9   :  { %1822 = vmatpush3.bf16.msra.mxu1 %v1906_v55  ;;  %1063 = vmatprep.mubr.bf16.mxu0 %v2031_v0  ;;  %v1933_v55 = vld [vmem:[%s2541_s5] ss:$8 sps:$4 sm:$0xff]  }
 0x4fa   :  { %1823 = vmatprep.subr.bf16.mxu1 %v1907_v60 }
 0x4fd   :  { %1824 = vmatpush3.bf16.msra.mxu1 %v1907_v60 }
 0x4fe   :  { %1825 = vmatprep.subr.bf16.mxu1 %v1908_v61 }
 0x501   :  { %1826 = vmatpush3.bf16.msra.mxu1 %v1908_v61 }
 0x502   :  { %1827 = vmatprep.subr.bf16.mxu1 %v1909_v62 }
 0x505   :  { %1828 = vmatpush3.bf16.msra.mxu1 %v1909_v62 }
 0x506   :  { %1829 = vmatprep.subr.bf16.mxu1 %v1910_v63 }
 0x509   :  { %1830 = vmatpush3.bf16.msra.mxu1 %v1910_v63 }
 0x50a   :  { %1831 = vmatprep.subr.bf16.mxu1 %v1911_v1 }
 0x50d   :  { %1832 = vmatpush3.bf16.msra.mxu1 %v1911_v1 }
 0x5b0   :  { %v684_v2 = vpop.f32.mrf.mxu1 }
 0x5b2   :  { %v1809_v3 = vpop.f32.mrf.mxu1 }
 0x5b4   :  { %v687_v4 = vpop.f32.mrf.mxu1 }
 0x5b5   :  { %v735_v5 = vpack.c.bf16 %v687_v4, %v684_v2 }
 0x5b6   :  { %v1810_v6 = vpop.f32.mrf.mxu1 }
 0x5b7   :  { %1833 = vmatprep.mubr.bf16.mxu1 %v735_v5  ;;  %v900_v5 = vsub.s32 3, %v2121_v11 }
 0x5b8   :  { %v728_v7 = vpop.f32.mrf.mxu0 }
 0x5ba   :  { %v1815_v8 = vpop.f32.mrf.mxu0 }
 0x5bb   :  { %v901_v8 = vrot.slane %v2129_v13, %v900_v5 }
 0x5bc   :  { %v731_v9 = vpop.f32.mrf.mxu0 }
 0x5bd   :  { %v736_v10 = vpack.c.bf16 %v731_v9, %v728_v7  ;;  %v908_v9 = vsub.s32 4, %v2121_v11 }
 0x5be   :  { %v1816_v14 = vpop.f32.mrf.mxu0 }
 0x5bf   :  { %1834 = vmatmul.mubr.bf16.vlgmr.msra.gmra.mxu1 %v736_v10 }
 0x67f   :  { %v1835_v15 = vpop.f32.mrf.mxu1 }
 0x680   :  { %v2305_v21 = vadd.f32 %v1835_v15, %v2136_v19  ;;  %v1914_v19 = vld [vmem:[%s2541_s5 + $0x74] ss:$8 sps:$4 sm:$0xff]  }
 0x681   :  { %v835_v16 = vpop.f32.mrf.mxu1  ;;  %1031 = vmatprep.subr.bf16.mxu0 %v1914_v19 }
 0x682   :  { %v2301_v17 = vadd.f32 %v835_v16, %v2141_v23  ;;  %v1912_v23 = vld [vmem:[%s2541_s5 + $0x70] ss:$8 sps:$4 sm:$0xff]   ;;  %v909_v16 = vrot.slane %v2129_v13, %v908_v9 }
 0x683   :  { %v1836_v18 = vpop.f32.mrf.mxu1  ;;  %1032 = vmatpush1.bf16.msra.mxu0 %v1912_v23 }
 0x684   :  { %854 = vadd.xlane.f32.xlu0 %v2301_v17  ;;  %v2313_v24 = vadd.f32 %v1836_v18, %v2144_v26  ;;  %1033 = vmatprep.subr.bf16.mxu0 %v1917_v36  ;;  %v1944_v36 = vld [vmem:[%s2542_s6 + $0x58] sm:$0xff]  }
 0x685   :  { %v838_v20 = vpop.f32.mrf.mxu1 }
 0x686   :  { %v2308_v22 = vadd.f32 %v838_v20, %v2147_v28 }
 0x687   :  { %1034 = vmatpush1.bf16.msra.mxu0 %v1915_v45  ;;  %v1945_v45 = vld [vmem:[%s2542_s6 + $0x18] sm:$0xff]  }
 0x688   :  { %858 = vadd.xlane.f32.xlu0 %v2305_v21  ;;  %856 = vadd.xlane.f32.xlu1 %v2308_v22 }
 0x689   :  { %1035 = vmatprep.subr.bf16.mxu0 %v1920_v46  ;;  %v1946_v46 = vld [vmem:[%s2542_s6 + $0x50] sm:$0xff]  }
 0x68b   :  { %1036 = vmatpush1.bf16.msra.mxu0 %v1918_v47  ;;  %v1947_v47 = vld [vmem:[%s2542_s6 + $0x10] sm:$0xff]  }
 0x68c   :  { %860 = vadd.xlane.f32.xlu1 %v2313_v24  ;;  %1037 = vmatprep.subr.bf16.mxu0 %v1923_v48  ;;  %v1948_v48 = vld [vmem:[%s2542_s6 + $0x48] sm:$0xff]  }
 0x68f   :  { %1038 = vmatpush1.bf16.msra.mxu0 %v1921_v42  ;;  %v1949_v42 = vld [vmem:[%s2542_s6 + $0x8] sm:$0xff]  }
 0x690   :  { %1039 = vmatprep.subr.bf16.mxu0 %v1926_v43  ;;  %v1951_v43 = vld [vmem:[%s2542_s6] sm:$0xff]  }
 0x693   :  { %1040 = vmatpush1.bf16.msra.mxu0 %v1924_v38  ;;  %v1950_v38 = vld [vmem:[%s2542_s6 + $0x40] sm:$0xff]  }
 0x694   :  { %1041 = vmatprep.subr.bf16.mxu0 %v1929_v50  ;;  %v2034_v50 = vmov 1966171168  }
 0x697   :  { %1042 = vmatpush1.bf16.msra.mxu0 %v1927_v51  ;;  %v42_v51 = vunpack.c.l.s4 %v2034_v50 }
 0x698   :  { %1043 = vmatprep.subr.bf16.mxu0 %v1932_v52 }
 0x699   :  { %v43_v52 = vunpack.c.0.s8 %v42_v51 }
 0x69b   :  { %1044 = vmatpush1.bf16.msra.mxu0 %v1930_v53  ;;  %v39_v53 = vrot.slane %v2129_v13, 6 }
 0x69c   :  { %1045 = vmatprep.subr.bf16.mxu0 %v1935_v54  ;;  %v46_v54 = vsub.s32 %v43_v52, %v2121_v11 }
 0x69f   :  { %1046 = vmatpush1.bf16.msra.mxu0 %v1933_v55  ;;  %v47_v55 = vrot.slane %v39_v53, %v46_v54 }
 0x6a0   :  { %1837 = vmatprep.subr.bf16.mxu0 %v2032_v49 }
 0x70d   :  { %v855_v28 = vpop.xlane.xlu0 %854 }
 0x70e   :  { %v862_v25 = vmul.f32 0.0078125, %v855_v28 }
 0x710   :  { %v2323_v27 = vsub.f32 %v2301_v17, %v862_v25 }
 0x711   :  { %v859_v29 = vpop.xlane.xlu0 %858  ;;  %v857_v26 = vpop.xlane.xlu1 %856 }
 0x712   :  { %v864_v30 = vmul.f32 0.0078125, %v859_v29  ;;  %v863_v31 = vmul.f32 0.0078125, %v857_v26  ;;  %v870_v32 = vmul.f32 %v2323_v27, %v2323_v27 }
 0x714   :  { %v2328_v33 = vsub.f32 %v2305_v21, %v864_v30  ;;  %v867_v34 = vsub.f32 %v2308_v22, %v863_v31  ;;  %874 = vadd.xlane.f32.xlu0 %v870_v32 }
 0x715   :  { %v861_v35 = vpop.xlane.xlu1 %860 }
 0x716   :  { %v865_v37 = vmul.f32 0.0078125, %v861_v35  ;;  %v872_v39 = vmul.f32 %v2328_v33, %v2328_v33  ;;  %v871_v40 = vmul.f32 %v867_v34, %v867_v34  ;;  %v1936_v35 = vld [vmem:[%s2542_s6 + $0x78] sm:$0xff]  }
 0x717   :  { %1716 = vmatprep.subr.bf16.mxu1 %v1936_v35 }
 0x718   :  { %v869_v41 = vsub.f32 %v2313_v24, %v865_v37  ;;  %878 = vadd.xlane.f32.xlu0 %v872_v39  ;;  %876 = vadd.xlane.f32.xlu1 %v871_v40  ;;  %v1939_v37 = vld [vmem:[%s2542_s6 + $0x30] sm:$0xff]   ;;  %v1940_v39 = vld [vmem:[%s2542_s6 + $0x68] sm:$0xff]  }
 0x719   :  { %v1941_v40 = vld [vmem:[%s2542_s6 + $0x28] sm:$0xff]  }
 0x71a   :  { %v873_v44 = vmul.f32 %v869_v41, %v869_v41 }
 0x71c   :  { %880 = vadd.xlane.f32.xlu1 %v873_v44  ;;  %v1943_v44 = vld [vmem:[%s2542_s6 + $0x20] sm:$0xff]  }
 0x79d   :  { %v875_v56 = vpop.xlane.xlu0 %874 }
 0x79e   :  { %v882_v57 = vmul.f32 0.0078125, %v875_v56  ;;  %v936_v56 = vrot.slane %v47_v55, %v2124_v12 }
 0x7a0   :  { %v886_v58 = vadd.f32 1e-05, %v882_v57  ;;  %v940_v57 = vrot.slane %v47_v55, %v908_v9 }
 0x7a1   :  { %v879_v59 = vpop.xlane.xlu0 %878  ;;  %v877_v60 = vpop.xlane.xlu1 %876 }
 0x7a2   :  { %1984 = vrsqrt.f32 %v886_v58  ;;  %v884_v61 = vmul.f32 0.0078125, %v879_v59  ;;  %v883_v62 = vmul.f32 0.0078125, %v877_v60  ;;  %v946_v58 = vrot.slane %v936_v56, %v2124_v12 }
 0x7a3   :  { %v950_v59 = vrot.slane %v940_v57, %v2124_v12 }
 0x7a4   :  { %v887_v63 = vadd.f32 1e-05, %v883_v62  ;;  %v888_v1 = vadd.f32 1e-05, %v884_v61 }
 0x7a5   :  { %v881_v2 = vpop.xlane.xlu1 %880 }
 0x7a6   :  { %v885_v3 = vmul.f32 0.0078125, %v881_v2  ;;  %1986 = vrsqrt.f32 %v887_v63 }
 0x7a7   :  { %1988 = vrsqrt.f32 %v888_v1 }
 0x7a8   :  { %v889_v4 = vadd.f32 1e-05, %v885_v3 }
 0x7aa   :  { %1990 = vrsqrt.f32 %v889_v4 }
 0x7af   :  { %v1985_v6 = vpop.eup %1984 }
 0x7b0   :  { %v894_v7 = vmul.f32 %v1985_v6, %v2323_v27 }
 0x7b2   :  { %v902_v15 = vmul.f32 %v901_v8, %v894_v7 }
 0x7b3   :  { %v1987_v10 = vpop.eup %1986 }
 0x7b4   :  { %v895_v14 = vmul.f32 %v1987_v10, %v867_v34  ;;  %v1989_v18 = vpop.eup %1988  ;;  %v910_v28 = vadd.f32 %v909_v16, %v902_v15 }
 0x7b5   :  { %v896_v29 = vmul.f32 %v1989_v18, %v2328_v33  ;;  %v1937_v33 = vld [vmem:[%s2542_s6 + $0x38] sm:$0xff]  }
 0x7b6   :  { %v903_v23 = vmul.f32 %v901_v8, %v895_v14  ;;  %1717 = vmatpush3.bf16.msra.mxu1 %v1937_v33 }
 0x7b7   :  { %v1991_v20 = vpop.eup %1990  ;;  %v904_v27 = vmul.f32 %v901_v8, %v896_v29 }
 0x7b8   :  { %v897_v19 = vmul.f32 %v1991_v20, %v869_v41  ;;  %v911_v25 = vadd.f32 %v909_v16, %v903_v23  ;;  %v1942_v41 = vld [vmem:[%s2542_s6 + $0x60] sm:$0xff]  }
 0x7b9   :  { %v912_v32 = vadd.f32 %v909_v16, %v904_v27 }
 0x7ba   :  { %v914_v26 = vpack.c.bf16 %v911_v25, %v910_v28  ;;  %v905_v30 = vmul.f32 %v901_v8, %v897_v19 }
 0x7bc   :  { %1064 = vmatmul.mubr.bf16.vlgmr.msra.gmra.mxu0 %v914_v26  ;;  %v913_v31 = vadd.f32 %v909_v16, %v905_v30 }
 0x7bd   :  { %1073 = vmatprep.mubr.bf16.mxu0 %v2031_v0  ;;  %v1938_v0 = vld [vmem:[%s2542_s6 + $0x70] sm:$0xff]  }
 0x7be   :  { %v915_v34 = vpack.c.bf16 %v913_v31, %v912_v32  ;;  %1718 = vmatprep.subr.bf16.mxu1 %v1938_v0 }
 0x7bf   :  { %1719 = vmatpush3.bf16.msra.mxu1 %v1939_v37 }
 0x7c0   :  { %1720 = vmatprep.subr.bf16.mxu1 %v1940_v39 }
 0x7c3   :  { %1721 = vmatpush3.bf16.msra.mxu1 %v1941_v40 }
 0x7c4   :  { %1074 = vmatmul.mubr.bf16.gmra.mxu0 %v915_v34  ;;  %1722 = vmatprep.subr.bf16.mxu1 %v1942_v41 }
 0x7c5   :  { %1853 = vmatprep.mubr.msk.bf16.mxu0 %vm2033_vm0, %v2032_v49 }
 0x7c7   :  { %1723 = vmatpush3.bf16.msra.mxu1 %v1943_v44 }
 0x7c8   :  { %1724 = vmatprep.subr.bf16.mxu1 %v1944_v36 }
 0x7cb   :  { %1725 = vmatpush3.bf16.msra.mxu1 %v1945_v45 }
 0x7cc   :  { %1726 = vmatprep.subr.bf16.mxu1 %v1946_v46 }
 0x7cf   :  { %1727 = vmatpush3.bf16.msra.mxu1 %v1947_v47 }
 0x7d0   :  { %1728 = vmatprep.subr.bf16.mxu1 %v1948_v48 }
 0x7d3   :  { %1729 = vmatpush3.bf16.msra.mxu1 %v1949_v42 }
 0x7d4   :  { %1730 = vmatprep.subr.bf16.mxu1 %v1950_v38 }
 0x7d7   :  { %1731 = vmatpush3.bf16.msra.mxu1 %v1951_v43 }
 0x87c   :  { %v1065_v60 = vpop.f32.mrf.mxu0 }
 0x87d   :  { %v2439_v61 = vadd.f32 %v1065_v60, %v946_v58 }
 0x87e   :  { %v1067_v62 = vpop.f32.mrf.mxu0 }
 0x87f   :  { %v1084_v63 = vmul.f32 %v2439_v61, %v2439_v61  ;;  %v2443_v1 = vadd.f32 %v1067_v62, %v950_v59 }
 0x880   :  { %v1069_v13 = vpop.f32.mrf.mxu0 }
 0x881   :  { %v1092_v2 = vmul.f32 %v1084_v63, %v2439_v61  ;;  %v1085_v3 = vmul.f32 %v2443_v1, %v2443_v1  ;;  %v2448_v4 = vadd.f32 %v1069_v13, %v946_v58 }
 0x882   :  { %v1071_v5 = vpop.f32.mrf.mxu0 }
 0x883   :  { %v1100_v6 = vmul.f32 0.044715, %v1092_v2  ;;  %v1093_v12 = vmul.f32 %v1085_v3, %v2443_v1  ;;  %v1086_v7 = vmul.f32 %v2448_v4, %v2448_v4  ;;  %v2453_v8 = vadd.f32 %v1071_v5, %v950_v59 }
 0x884   :  { %v1075_v9 = vpop.f32.mrf.mxu0 }
 0x885   :  { %v1108_v10 = vadd.f32 %v1100_v6, %v2439_v61  ;;  %v1101_v14 = vmul.f32 0.044715, %v1093_v12  ;;  %v1094_v15 = vmul.f32 %v1086_v7, %v2448_v4  ;;  %v1087_v16 = vmul.f32 %v2453_v8, %v2453_v8 }
 0x886   :  { %v2459_v18 = vadd.f32 %v1075_v9, %v946_v58  ;;  %v1077_v20 = vpop.f32.mrf.mxu0 }
 0x887   :  { %v1116_v23 = vmul.f32 0.7978846, %v1108_v10  ;;  %v1109_v19 = vadd.f32 %v1101_v14, %v2443_v1  ;;  %v1102_v28 = vmul.f32 0.044715, %v1094_v15  ;;  %v1095_v25 = vmul.f32 %v1087_v16, %v2453_v8 }
 0x888   :  { %v1088_v29 = vmul.f32 %v2459_v18, %v2459_v18  ;;  %v2465_v26 = vadd.f32 %v1077_v20, %v950_v59  ;;  %v1079_v30 = vpop.f32.mrf.mxu0 }
 0x889   :  { %v1117_v27 = vmul.f32 0.7978846, %v1109_v19  ;;  %v1110_v31 = vadd.f32 %v1102_v28, %v2448_v4  ;;  %v1103_v32 = vmul.f32 0.044715, %v1095_v25  ;;  %1992 = vtanh.f32 %v1116_v23 }
 0x88a   :  { %v1096_v34 = vmul.f32 %v1088_v29, %v2459_v18  ;;  %v1089_v35 = vmul.f32 %v2465_v26, %v2465_v26  ;;  %v1080_v33 = vadd.f32 %v1079_v30, %v946_v58  ;;  %v1081_v0 = vpop.f32.mrf.mxu0 }
 0x88b   :  { %1994 = vtanh.f32 %v1117_v27  ;;  %v1118_v37 = vmul.f32 0.7978846, %v1110_v31  ;;  %v1111_v39 = vadd.f32 %v1103_v32, %v2453_v8  ;;  %v1082_v40 = vadd.f32 %v1081_v0, %v950_v59 }
 0x88c   :  { %v1104_v41 = vmul.f32 0.044715, %v1096_v34  ;;  %v1097_v44 = vmul.f32 %v1089_v35, %v2465_v26  ;;  %v1090_v36 = vmul.f32 %v1080_v33, %v1080_v33 }
 0x88d   :  { %1996 = vtanh.f32 %v1118_v37  ;;  %v1119_v45 = vmul.f32 0.7978846, %v1111_v39  ;;  %v1091_v46 = vmul.f32 %v1082_v40, %v1082_v40 }
 0x88e   :  { %v1112_v47 = vadd.f32 %v1104_v41, %v2459_v18  ;;  %v1105_v48 = vmul.f32 0.044715, %v1097_v44  ;;  %v1098_v42 = vmul.f32 %v1090_v36, %v1080_v33  ;;  %v1952_v41 = vld [vmem:[%s2543_s7 + $0x38] sm:$0xff]   ;;  %v1957_v44 = vld [vmem:[%s2543_s7 + $0x10] sm:$0xff]   ;;  %v1958_v36 = vld [vmem:[%s2543_s7 + $0x8] sm:$0xff]  }
 0x88f   :  { %1998 = vtanh.f32 %v1119_v45  ;;  %v1099_v38 = vmul.f32 %v1091_v46, %v1082_v40  ;;  %1838 = vmatpush3.bf16.msra.mxu0 %v1952_v41  ;;  %v1959_v45 = vld [vmem:[%s2543_s7] sm:$0xff]   ;;  %v1343_v46 = vsub.s32 5, %v2121_v11 }
 0x890   :  { %v1120_v43 = vmul.f32 0.7978846, %v1112_v47  ;;  %v1113_v50 = vadd.f32 %v1105_v48, %v2465_v26  ;;  %v1106_v51 = vmul.f32 0.044715, %v1098_v42  ;;  %1839 = vmatprep.subr.bf16.mxu0 %v2032_v49 }
 0x891   :  { %v1107_v52 = vmul.f32 0.044715, %v1099_v38  ;;  %v2008_v38 = vld [vmem:[%s2545_s9] sm:$0xff] }
 0x892   :  { %2000 = vtanh.f32 %v1120_v43  ;;  %v1121_v53 = vmul.f32 0.7978846, %v1113_v50  ;;  %v1114_v54 = vadd.f32 %v1106_v51, %v1080_v33  ;;  %v1344_v43 = vrot.slane %v2008_v38, %v1343_v46 }
 0x893   :  { %v1115_v55 = vadd.f32 %v1107_v52, %v1082_v40 }
 0x894   :  { %2002 = vtanh.f32 %v1121_v53  ;;  %v1122_v56 = vmul.f32 0.7978846, %v1114_v54 }
 0x895   :  { %v1123_v57 = vmul.f32 0.7978846, %v1115_v55 }
 0x896   :  { %2004 = vtanh.f32 %v1122_v56  ;;  %v1993_v58 = vpop.eup %1992 }
 0x897   :  { %2006 = vtanh.f32 %v1123_v57  ;;  %v1132_v63 = vadd.f32 1.0, %v1993_v58 }
 0x898   :  { %v1995_v59 = vpop.eup %1994 }
 0x899   :  { %v1133_v60 = vadd.f32 1.0, %v1995_v59  ;;  %v1140_v12 = vmul.f32 0.5, %v1132_v63 }
 0x89a   :  { %v1997_v62 = vpop.eup %1996 }
 0x89b   :  { %v1134_v13 = vadd.f32 1.0, %v1997_v62  ;;  %v1141_v6 = vmul.f32 0.5, %v1133_v60  ;;  %v1148_v20 = vmul.f32 %v1140_v12, %v2439_v61 }
 0x89c   :  { %v1999_v2 = vpop.eup %1998 }
 0x89d   :  { %v1142_v3 = vmul.f32 0.5, %v1134_v13  ;;  %v1135_v5 = vadd.f32 1.0, %v1999_v2  ;;  %v1149_v15 = vmul.f32 %v1141_v6, %v2443_v1 }
 0x89f   :  { %v2001_v7 = vpop.eup %2000  ;;  %v1143_v9 = vmul.f32 0.5, %v1135_v5  ;;  %v1150_v10 = vmul.f32 %v1142_v3, %v2448_v4 }
 0x8a0   :  { %v1136_v19 = vadd.f32 1.0, %v2001_v7 }
 0x8a1   :  { %v2003_v14 = vpop.eup %2002  ;;  %v1151_v16 = vmul.f32 %v1143_v9, %v2453_v8  ;;  %v1156_v30 = vpack.c.bf16 %v1150_v10, %v1148_v20 }
 0x8a2   :  { %v1137_v23 = vadd.f32 1.0, %v2003_v14  ;;  %v1144_v34 = vmul.f32 0.5, %v1136_v19 }
 0x8a3   :  { %v2005_v28 = vpop.eup %2004  ;;  %v1157_v25 = vpack.c.bf16 %v1151_v16, %v1149_v15 }
 0x8a4   :  { %v2007_v29 = vpop.eup %2006  ;;  %v1138_v27 = vadd.f32 1.0, %v2005_v28  ;;  %v1145_v32 = vmul.f32 0.5, %v1137_v23  ;;  %v1152_v61 = vmul.f32 %v1144_v34, %v2459_v18  ;;  %v1954_v18 = vld [vmem:[%s2543_s7 + $0x28] sm:$0xff]  }
 0x8a5   :  { %1320 = vmatprep.mubr.bf16.mxu1 %v1157_v25  ;;  %v1139_v31 = vadd.f32 1.0, %v2007_v29 }
 0x8a6   :  { %1321 = vmatmul.mubr.bf16.vlgmr.msra.gmra.mxu1 %v1156_v30  ;;  %v1146_v4 = vmul.f32 0.5, %v1138_v27  ;;  %v1153_v1 = vmul.f32 %v1145_v32, %v2465_v26  ;;  %v1955_v26 = vld [vmem:[%s2543_s7 + $0x20] sm:$0xff]  }
 0x8a7   :  { %v1147_v35 = vmul.f32 0.5, %v1139_v31 }
 0x8a8   :  { %v1154_v0 = vmul.f32 %v1146_v4, %v1080_v33  ;;  %v1953_v33 = vld [vmem:[%s2543_s7 + $0x30] sm:$0xff]  }
 0x8a9   :  { %v1155_v8 = vmul.f32 %v1147_v35, %v1082_v40  ;;  %1840 = vmatpush3.bf16.msra.mxu0 %v1953_v33  ;;  %v1956_v40 = vld [vmem:[%s2543_s7 + $0x18] sm:$0xff]  }
 0x8aa   :  { %v1158_v39 = vpack.c.bf16 %v1154_v0, %v1152_v61  ;;  %1841 = vmatprep.subr.bf16.mxu0 %v2032_v49 }
 0x8ab   :  { %v1159_v37 = vpack.c.bf16 %v1155_v8, %v1153_v1 }
 0x8ad   :  { %1328 = vmatprep.mubr.bf16.mxu1 %v1159_v37  ;;  %1842 = vmatpush3.bf16.msra.mxu0 %v1954_v18 }
 0x8ae   :  { %1329 = vmatmul.mubr.bf16.gmra.mxu1 %v1158_v39  ;;  %1843 = vmatprep.subr.bf16.mxu0 %v2032_v49 }
 0x8b1   :  { %1844 = vmatpush3.bf16.msra.mxu0 %v1955_v26 }
 0x8b2   :  { %1845 = vmatprep.subr.bf16.mxu0 %v2032_v49 }
 0x8b5   :  { %1846 = vmatpush3.bf16.msra.mxu0 %v1956_v40 }
 0x8b6   :  { %1847 = vmatprep.subr.bf16.mxu0 %v2032_v49 }
 0x8b9   :  { %1848 = vmatpush3.bf16.msra.mxu0 %v1957_v44 }
 0x8ba   :  { %1849 = vmatprep.subr.bf16.mxu0 %v2032_v49 }
 0x8bd   :  { %1850 = vmatpush3.bf16.msra.mxu0 %v1958_v36 }
 0x8be   :  { %1851 = vmatprep.subr.bf16.mxu0 %v2032_v49 }
 0x8c1   :  { %1852 = vmatpush3.bf16.msra.mxu0 %v1959_v45 }
 0x966   :  { %v1732_v47 = vpop.f32.mrf.mxu1 }
 0x968   :  { %v1733_v48 = vpop.f32.mrf.mxu1 }
 0x969   :  { %v1734_v42 = vadd.f32 %v1733_v48, %v1732_v47 }
 0x96a   :  { %v1735_v50 = vpop.f32.mrf.mxu1 }
 0x96b   :  { %v1337_v51 = vadd.f32 %v1734_v42, %v2301_v17 }
 0x96c   :  { %v1736_v49 = vpop.f32.mrf.mxu1 }
 0x96d   :  { %v1345_v52 = vadd.f32 %v1344_v43, %v1337_v51  ;;  %v1737_v53 = vadd.f32 %v1736_v49, %v1735_v50 }
 0x96e   :  { %v1738_v54 = vpop.f32.mrf.mxu1 }
 0x96f   :  { %v1353_v55 = vcombine.high %v1345_v52, %v1345_v52  ;;  %v1362_v56 = vsel %vm1361_vm2, %v1345_v52, 0.0  ;;  %v1338_v11 = vadd.f32 %v1737_v53, %v2308_v22 }
 0x970   :  { %v1363_v57 = vrot.slane %v1362_v56, 4  ;;  %v1739_v58 = vpop.f32.mrf.mxu1 }
 0x971   :  { %v1369_v59 = vsel %vm1361_vm2, %v1353_v55, 0.0  ;;  %v1346_v60 = vadd.f32 %v1344_v43, %v1338_v11  ;;  %v1740_v62 = vadd.f32 %v1739_v58, %v1738_v54 }
 0x972   :  { %v1364_v63 = vadd.f32 %v1363_v57, %v1362_v56  ;;  %v1370_v13 = vrot.slane %v1369_v59, 4  ;;  %v1741_v2 = vpop.f32.mrf.mxu1 }
 0x973   :  { %v1354_v17 = vcombine.high %v1346_v60, %v1346_v60  ;;  %v1376_v3 = vsel %vm1361_vm2, %v1346_v60, 0.0  ;;  %v1339_v5 = vadd.f32 %v1740_v62, %v2305_v21 }
 0x974   :  { %v1365_v6 = vrot.slane %v1364_v63, 2  ;;  %v1371_v12 = vadd.f32 %v1370_v13, %v1369_v59  ;;  %v1377_v7 = vrot.slane %v1376_v3, 4  ;;  %v1742_v9 = vpop.f32.mrf.mxu1 }
 0x975   :  { %v1383_v22 = vsel %vm1361_vm2, %v1354_v17, 0.0  ;;  %v1347_v10 = vadd.f32 %v1344_v43, %v1339_v5  ;;  %v1743_v14 = vadd.f32 %v1742_v9, %v1741_v2 }
 0x976   :  { %v1366_v15 = vadd.f32 %v1365_v6, %v1364_v63  ;;  %v1372_v16 = vrot.slane %v1371_v12, 2  ;;  %v1378_v20 = vadd.f32 %v1377_v7, %v1376_v3  ;;  %v1384_v23 = vrot.slane %v1383_v22, 4 }
 0x977   :  { %v1355_v19 = vcombine.high %v1347_v10, %v1347_v10  ;;  %v1390_v28 = vsel %vm1361_vm2, %v1347_v10, 0.0  ;;  %v1340_v25 = vadd.f32 %v1743_v14, %v2313_v24 }
 0x978   :  { %v1367_v29 = vrot.slane %v1366_v15, 1  ;;  %v1373_v30 = vadd.f32 %v1372_v16, %v1371_v12  ;;  %v1379_v21 = vrot.slane %v1378_v20, 2  ;;  %v1385_v27 = vadd.f32 %v1384_v23, %v1383_v22 }
 0x979   :  { %v1391_v31 = vrot.slane %v1390_v28, 4  ;;  %v1397_v32 = vsel %vm1361_vm2, %v1355_v19, 0.0  ;;  %v1348_v34 = vadd.f32 %v1344_v43, %v1340_v25 }
 0x97a   :  { %v1368_v4 = vadd.f32 %v1367_v29, %v1366_v15  ;;  %v1374_v35 = vrot.slane %v1373_v30, 1  ;;  %v1380_v0 = vadd.f32 %v1379_v21, %v1378_v20  ;;  %v1386_v1 = vrot.slane %v1385_v27, 2 }
 0x97b   :  { %v1392_v8 = vadd.f32 %v1391_v31, %v1390_v28  ;;  %v1398_v61 = vrot.slane %v1397_v32, 4  ;;  %v1356_v37 = vcombine.high %v1348_v34, %v1348_v34  ;;  %v1404_v39 = vsel %vm1361_vm2, %v1348_v34, 0.0 }
 0x97c   :  { %v1375_v41 = vadd.f32 %v1374_v35, %v1373_v30  ;;  %v1419_v24 = vmul.f32 0.25, %v1368_v4  ;;  %v1381_v33 = vrot.slane %v1380_v0, 1  ;;  %v1387_v18 = vadd.f32 %v1386_v1, %v1385_v27 }
 0x97d   :  { %v1393_v26 = vrot.slane %v1392_v8, 2  ;;  %v1399_v40 = vadd.f32 %v1398_v61, %v1397_v32  ;;  %v1405_v44 = vrot.slane %v1404_v39, 4  ;;  %v1411_v36 = vsel %vm1361_vm2, %v1356_v37, 0.0 }
 0x97e   :  { %v1420_v45 = vmul.f32 0.25, %v1375_v41  ;;  %v1427_v46 = vpack.c.bf16 %v1419_v24, %v1419_v24  ;;  %v1382_v47 = vadd.f32 %v1381_v33, %v1380_v0  ;;  %v1388_v48 = vrot.slane %v1387_v18, 1 }
 0x97f   :  { %v1394_v42 = vadd.f32 %v1393_v26, %v1392_v8  ;;  %v1400_v38 = vrot.slane %v1399_v40, 2  ;;  %v1406_v43 = vadd.f32 %v1405_v44, %v1404_v39  ;;  %v1412_v50 = vrot.slane %v1411_v36, 4  ;;  %v1669_v8 = vld [vmem:[%s2544_s8] ss:$0 sm:$0xff] }
 0x980   :  { %v1428_v51 = vpack.c.bf16 %v1420_v45, %v1420_v45  ;;  %v1389_v49 = vadd.f32 %v1388_v48, %v1387_v18  ;;  %v1421_v52 = vmul.f32 0.25, %v1382_v47  ;;  %v1466_v11 = vunpack.c.l.b16 %v1427_v46 }
 0x981   :  { %v1395_v53 = vrot.slane %v1394_v42, 1  ;;  %v1401_v54 = vadd.f32 %v1400_v38, %v1399_v40  ;;  %v1407_v55 = vrot.slane %v1406_v43, 2  ;;  %v1413_v56 = vadd.f32 %v1412_v50, %v1411_v36 }
 0x982   :  { %v1467_v57 = vunpack.c.l.b16 %v1428_v51  ;;  %v1422_v58 = vmul.f32 0.25, %v1389_v49  ;;  %v1429_v59 = vpack.c.bf16 %v1421_v52, %v1421_v52 }
 0x983   :  { %v1396_v60 = vadd.f32 %v1395_v53, %v1394_v42  ;;  %v1402_v62 = vrot.slane %v1401_v54, 1  ;;  %v1408_v63 = vadd.f32 %v1407_v55, %v1406_v43  ;;  %v1414_v13 = vrot.slane %v1413_v56, 2 }
 0x984   :  { %v1475_v2 = vsel %vm1474_vm3, %v1467_v57, %v1466_v11  ;;  %v1430_v17 = vpack.c.bf16 %v1422_v58, %v1422_v58  ;;  %v1468_v3 = vunpack.c.l.b16 %v1429_v59 }
 0x985   :  { %v1403_v5 = vadd.f32 %v1402_v62, %v1401_v54  ;;  %v1423_v6 = vmul.f32 0.25, %v1396_v60  ;;  %v1409_v12 = vrot.slane %v1408_v63, 1  ;;  %v1415_v7 = vadd.f32 %v1414_v13, %v1413_v56 }
 0x986   :  { %v1469_v9 = vunpack.c.l.b16 %v1430_v17  ;;  %v1477_v22 = vsel %vm1476_vm4, %v1468_v3, %v1475_v2 }
 0x987   :  { %v1424_v10 = vmul.f32 0.25, %v1403_v5  ;;  %v1431_v14 = vpack.c.bf16 %v1423_v6, %v1423_v6  ;;  %v1410_v15 = vadd.f32 %v1409_v12, %v1408_v63  ;;  %v1416_v16 = vrot.slane %v1415_v7, 1 }
 0x988   :  { %v1479_v20 = vsel %vm1478_vm5, %v1469_v9, %v1477_v22 }
 0x989   :  { %v1432_v23 = vpack.c.bf16 %v1424_v10, %v1424_v10  ;;  %v1470_v19 = vunpack.c.l.b16 %v1431_v14  ;;  %v1417_v28 = vadd.f32 %v1416_v16, %v1415_v7  ;;  %v1425_v25 = vmul.f32 0.25, %v1410_v15 }
 0x98b   :  { %v1471_v29 = vunpack.c.l.b16 %v1432_v23  ;;  %v1481_v30 = vsel %vm1480_vm6, %v1470_v19, %v1479_v20  ;;  %v1426_v21 = vmul.f32 0.25, %v1417_v28  ;;  %v1433_v27 = vpack.c.bf16 %v1425_v25, %v1425_v25 }
 0x98d   :  { %v1434_v31 = vpack.c.bf16 %v1426_v21, %v1426_v21  ;;  %v1472_v32 = vunpack.c.l.b16 %v1433_v27  ;;  %v1483_v34 = vsel %vm1482_vm7, %v1471_v29, %v1481_v30 }
 0x98f   :  { %v1473_v4 = vunpack.c.l.b16 %v1434_v31  ;;  %v1485_v35 = vsel %vm1484_vm8, %v1472_v32, %v1483_v34 }
 0x991   :  { %v1487_v0 = vsel %vm1486_vm9, %v1473_v4, %v1485_v35 }
 0x992   :  { %v1488_v1 = vpack.c.b16 %v1487_v0, %v1487_v0 }
 0x994   :  { %1854 = vmatmul.mubr.bf16.vlgmr.msra.gmra.mxu0 %v1488_v1 }
 0xa54   :  { %v1572_v61 = vpop.f32.mrf.mxu0 }
 0xa55   :  { %v1573_v37 = vadd.f32 %v1669_v8, %v1572_v61 }
 0xa56   :  { %v1855_v39 = vpop.f32.mrf.mxu0 }
 0xa57   :  { %1578 = vst [vmem:[#allocation2] sm:$0xff] %v1573_v37 }
 0xa58   :  { %v1575_v41 = vpop.f32.mrf.mxu0 }
 0xa59   :  { %2020 = shalt.err (!%p2017_p4)
}
 0xa5a   :  { %1588 = dma.vmem_to_hbm [thread:$0]  %s1586_s15, 128, %s2546_s10, [#allocation3]   ;;  %v1856_v24 = vpop.f32.mrf.mxu0 }
 0xa5b   :  { %2029 = dma.done.wait [#allocation3], 128  }
 0xa5c   :  { %2030 = vsyncadd [#allocation3], 4294967168 }
 0xa5d   :  { %1592 = vsyncpa [#allocation3], 1 }

</bundles_post_ra>
